<compile_context>
chip_gen: v7x
topology: tpu7x:2x2x1
jax: 0.10.0
libtpu: 0.0.40
codegen_flags: <defaults>
</compile_context>

<pallas_src>
import functools
import math

import jax
import jax.numpy as jnp
from jax import lax
from jax.experimental import pallas as pl
from jax.experimental.pallas import tpu as pltpu


def _round_up(x, m):
    return ((x + m - 1) // m) * m


def _doc_self_atten_kernel(q_ref, kv_ref, w_ref, o_ref,
                           pq_ref, m_ref, l_ref, acc_ref,
                           *, t_actual, tk, needs_mask, compute_dtype):
    """Refs (batch dim squeezed):
       q_ref  (Tq, C)  query rows of D        kv_ref (Tk, C) key/value rows of D
       w_ref  (H, C)   projection weight (bf16, resident)
       o_ref  (Tq, C)  output tile
       pq_ref (Tq, H)  projected queries (computed once per q-tile)
       m_ref/l_ref (Tq, 1) running max / running sum;  acc_ref (Tq, C) f32 acc
    """
    ki = pl.program_id(2)

    @pl.when(ki == 0)
    def _init():
        # Project this query tile once; W stays resident across the grid.
        q = q_ref[...].astype(compute_dtype)
        pq = lax.dot_general(q, w_ref[...],
                             dimension_numbers=(((1,), (1,)), ((), ())),
                             preferred_element_type=jnp.float32)      # (Tq, H)
        pq_ref[...] = pq.astype(pq_ref.dtype)
        m_ref[...] = jnp.full_like(m_ref, -jnp.inf)
        l_ref[...] = jnp.zeros_like(l_ref)
        acc_ref[...] = jnp.zeros_like(acc_ref)

    kv = kv_ref[...].astype(compute_dtype)                            # (Tk, C)

    # scores = proj(q) @ kv^T, contracting on the feature dim (no transpose).
    s = lax.dot_general(pq_ref[...], kv,
                        dimension_numbers=(((1,), (1,)), ((), ())),
                        preferred_element_type=jnp.float32)           # (Tq, Tk)
    if needs_mask:  # static: only emitted when T was padded up
        key_idx = ki * tk + lax.broadcasted_iota(jnp.int32, s.shape, 1)
        s = jnp.where(key_idx < t_actual, s, -jnp.inf)

    # Online (flash) softmax update with deferred normalization.
    m_prev = m_ref[...]
    m_new = jnp.maximum(m_prev, jnp.max(s, axis=-1, keepdims=True))
    alpha = jnp.exp(m_prev - m_new)
    e = jnp.exp(s - m_new)                                            # (Tq, Tk)
    l_ref[...] = alpha * l_ref[...] + jnp.sum(e, axis=-1, keepdims=True)
    acc_ref[...] = alpha * acc_ref[...] + lax.dot_general(
        e.astype(compute_dtype), kv,
        dimension_numbers=(((1,), (0,)), ((), ())),
        preferred_element_type=jnp.float32)                           # (Tq, C)
    m_ref[...] = m_new

    @pl.when(ki == pl.num_programs(2) - 1)
    def _finalize():
        o_ref[...] = (acc_ref[...] *
                      pl.reciprocal(l_ref[...], approx=True)).astype(o_ref.dtype)


def doc_self_atten(D, W, *, tq=128, tk=128, compute_dtype=jnp.bfloat16):
    """D: (B, T, C); W: (H, C) with H == C (nn.Linear weight). Returns (B, T, C).

    tq/tk are the query/key tile sizes (multiples of 8; larger tk, e.g. 256-512,
    amortizes the per-tile softmax VPU work on v5e).
    """
    B, T, C = D.shape
    H, Cw = W.shape
    assert C == Cw and H == C, "PyTorch forward requires hidden_size == input_size"

    # Clamp tiles to (8-rounded) T; sublane dim of a block must be a multiple of 8.
    tq = _round_up(min(tq, _round_up(T, 8)), 8)
    tk = _round_up(min(tk, _round_up(T, 8)), 8)
    t_pad = _round_up(T, math.lcm(tq, tk))
    needs_mask = t_pad != T

    d_in = D if not needs_mask else jnp.pad(D, ((0, 0), (0, t_pad - T), (0, 0)))
    w_in = W.astype(compute_dtype)          # hoist the cast out of the kernel

    nq, nk = t_pad // tq, t_pad // tk

    kernel = functools.partial(_doc_self_atten_kernel,
                               t_actual=T, tk=tk, needs_mask=needs_mask,
                               compute_dtype=compute_dtype)

    # Explicit VMEM budget (double-buffered tiles + resident scratch); keep it
    # well under v7x's 64 MiB physical / 32 MiB scoped default.
    in_bytes = jnp.dtype(D.dtype).itemsize
    cd_bytes = jnp.dtype(compute_dtype).itemsize
    vmem_est = (2 * tq * C * in_bytes        # double-buffered q tiles
                + 2 * tk * C * in_bytes      # double-buffered k tiles
                + 2 * tq * C * in_bytes      # double-buffered out tiles
                + 2 * H * C * cd_bytes       # resident weight
                + tq * H * cd_bytes          # projected-q scratch
                + tq * C * 4                 # f32 accumulator
                + 2 * tq * 128 * 4)          # m / l scratch (lane-padded)
    vmem_limit = int(min(max(2 * vmem_est, 8 << 20), 32 << 20))

    cost = pl.CostEstimate(
        flops=2 * B * (t_pad * C * H + t_pad * t_pad * H + t_pad * t_pad * C),
        transcendentals=B * t_pad * t_pad,
        bytes_accessed=(2 * B * t_pad * C + B * t_pad * C) * in_bytes
                       + H * C * cd_bytes)

    out = pl.pallas_call(
        kernel,
        out_shape=jax.ShapeDtypeStruct((B, t_pad, C), D.dtype),
        grid_spec=pltpu.PrefetchScalarGridSpec(
            num_scalar_prefetch=0,
            grid=(B, nq, nk),
            in_specs=[
                # query rows of D (constant across ki -> stays resident)
                pl.BlockSpec((pl.Squeezed(), tq, C), lambda b, qi, ki: (b, qi, 0)),
                # key/value rows of D (streamed along ki)
                pl.BlockSpec((pl.Squeezed(), tk, C), lambda b, qi, ki: (b, ki, 0)),
                # full weight, reused every step
                pl.BlockSpec((H, C), lambda b, qi, ki: (0, 0)),
            ],
            out_specs=pl.BlockSpec((pl.Squeezed(), tq, C),
                                   lambda b, qi, ki: (b, qi, 0)),
            scratch_shapes=[
                pltpu.VMEM((tq, H), compute_dtype),   # projected queries
                pltpu.VMEM((tq, 1), jnp.float32),     # running max
                pltpu.VMEM((tq, 1), jnp.float32),     # running sum
                pltpu.VMEM((tq, C), jnp.float32),     # output accumulator
            ]),
        compiler_params=pltpu.CompilerParams(
            dimension_semantics=("parallel", "parallel", "arbitrary"),
            vmem_limit_bytes=vmem_limit),
        cost_estimate=cost,
    )(d_in, d_in, w_in)

    return out if not needs_mask else out[:, :T, :]


def _reference(D, W):
    P = jnp.einsum("btc,hc->bth", D, W)          # proj(D)
    L = jnp.einsum("bth,bsh->bts", P, D)         # proj(D) @ D^T
    A = jax.nn.softmax(L, axis=-1)
    return jnp.einsum("bts,bsc->btc", A, D)      # A @ D


if __name__ == "__main__":
    # Small but lane-dense shapes: batch=2, seq=256, input_size=hidden_size=128.
    B, T, C = 2, 256, 128
    key = jax.random.PRNGKey(0)
    k_d, k_w = jax.random.split(key)

    D = jax.random.normal(k_d, (B, T, C), dtype=jnp.float32)
    # deterministic synthetic weight for nn.Linear(input_size, hidden_size, bias=False)
    W = jax.random.normal(k_w, (C, C), dtype=jnp.float32) * 0.01

    out = doc_self_atten(D, W)
    out = jax.block_until_ready(out)

    ref = _reference(D, W)
    assert out.shape == (B, T, C)
    # bf16 MXU operands with f32 accumulation -> loosened (but tight-enough) tolerance.
    assert jnp.allclose(out, ref, atol=5e-2, rtol=5e-2), "mismatch vs reference"

    print("KERNEL_OK")
</pallas_src>

<mosaic_0001>
module attributes {stable_mosaic.version = 11 : i64} {
  func.func @_doc_self_atten_kernel(%arg0: i32, %arg1: i32, %arg2: i32, %arg3: memref<1x128x128xf32, #tpu.memory_space<vmem>>, %arg4: memref<1x128x128xf32, #tpu.memory_space<vmem>>, %arg5: memref<128x128xbf16, #tpu.memory_space<vmem>>, %arg6: memref<1x128x128xf32, #tpu.memory_space<vmem>>, %arg7: memref<128x128xbf16, #tpu.memory_space<vmem>>, %arg8: memref<128x1xf32, #tpu.memory_space<vmem>>, %arg9: memref<128x1xf32, #tpu.memory_space<vmem>>, %arg10: memref<128x128xf32, #tpu.memory_space<vmem>>) attributes {dimension_semantics = [#tpu.dimension_semantics<parallel>, #tpu.dimension_semantics<parallel>, #tpu.dimension_semantics<arbitrary>], iteration_bounds = array<i64: 2, 2, 2>, scalar_prefetch = 0 : i64, scratch_operands = 4 : i64, tpu.core_type = #tpu.core_type<tc>, window_params = [{transform_indices = @transform_0, window_bounds = array<i64: 1, 128, 128>}, {transform_indices = @transform_1, window_bounds = array<i64: 1, 128, 128>}, {pipeline_mode = #tpu.pipeline_mode<synchronous>, transform_indices = @transform_2, window_bounds = array<i64: 128, 128>}, {transform_indices = @transform_3, window_bounds = array<i64: 1, 128, 128>}]} {
    %c0_i32 = arith.constant 0 : i32
    %0 = arith.cmpi eq, %arg2, %c0_i32 : i32
    %1 = arith.extui %0 : i1 to i32
    %c0_i32_0 = arith.constant 0 : i32
    %2 = arith.cmpi ne, %1, %c0_i32_0 : i32
    scf.if %2 {
      %c0_21 = arith.constant 0 : index
      %c0_22 = arith.constant 0 : index
      %c0_23 = arith.constant 0 : index
      %34 = vector.load %arg3[%c0_21, %c0_22, %c0_23] : memref<1x128x128xf32, #tpu.memory_space<vmem>>, vector<1x128x128xf32>
      %35 = vector.shape_cast %34 : vector<1x128x128xf32> to vector<128x128xf32>
      %36 = arith.truncf %35 : vector<128x128xf32> to vector<128x128xbf16>
      %c0_24 = arith.constant 0 : index
      %c0_25 = arith.constant 0 : index
      %37 = vector.load %arg5[%c0_24, %c0_25] : memref<128x128xbf16, #tpu.memory_space<vmem>>, vector<128x128xbf16>
      %cst_26 = arith.constant dense<0.000000e+00> : vector<128x128xf32>
      %38 = tpu.matmul %36, %37, %cst_26 {dimension_numbers = #tpu.dot_dimension_numbers<[1], [1], [0], [0], [0, 0, 1, 0], [], []>} : vector<128x128xbf16>, vector<128x128xbf16>, vector<128x128xf32> -> vector<128x128xf32>
      %39 = arith.truncf %38 : vector<128x128xf32> to vector<128x128xbf16>
      %c0_27 = arith.constant 0 : index
      %c0_28 = arith.constant 0 : index
      %40 = vector.load %arg7[%c0_27, %c0_28] : memref<128x128xbf16, #tpu.memory_space<vmem>>, vector<128x128xbf16>
      tpu.vector_store %arg7[%c0_27, %c0_28], %39 {strides = array<i32>} : memref<128x128xbf16, #tpu.memory_space<vmem>>, vector<128x128xbf16>,
      %cst_29 = arith.constant 0xFF800000 : f32
      %41 = vector.broadcast %cst_29 : f32 to vector<128x1xf32>
      %c0_30 = arith.constant 0 : index
      %c0_31 = arith.constant 0 : index
      %42 = vector.load %arg8[%c0_30, %c0_31] : memref<128x1xf32, #tpu.memory_space<vmem>>, vector<128x1xf32>
      tpu.vector_store %arg8[%c0_30, %c0_31], %41 {strides = array<i32>} : memref<128x1xf32, #tpu.memory_space<vmem>>, vector<128x1xf32>,
      %cst_32 = arith.constant 0.000000e+00 : f32
      %43 = vector.broadcast %cst_32 : f32 to vector<128x1xf32>
      %c0_33 = arith.constant 0 : index
      %c0_34 = arith.constant 0 : index
      %44 = vector.load %arg9[%c0_33, %c0_34] : memref<128x1xf32, #tpu.memory_space<vmem>>, vector<128x1xf32>
      tpu.vector_store %arg9[%c0_33, %c0_34], %43 {strides = array<i32>} : memref<128x1xf32, #tpu.memory_space<vmem>>, vector<128x1xf32>,
      %cst_35 = arith.constant 0.000000e+00 : f32
      %45 = vector.broadcast %cst_35 : f32 to vector<128x128xf32>
      %c0_36 = arith.constant 0 : index
      %c0_37 = arith.constant 0 : index
      %46 = vector.load %arg10[%c0_36, %c0_37] : memref<128x128xf32, #tpu.memory_space<vmem>>, vector<128x128xf32>
      tpu.vector_store %arg10[%c0_36, %c0_37], %45 {strides = array<i32>} : memref<128x128xf32, #tpu.memory_space<vmem>>, vector<128x128xf32>,
    } else {
    }
    %c0 = arith.constant 0 : index
    %c0_1 = arith.constant 0 : index
    %c0_2 = arith.constant 0 : index
    %3 = vector.load %arg4[%c0, %c0_1, %c0_2] : memref<1x128x128xf32, #tpu.memory_space<vmem>>, vector<1x128x128xf32>
    %4 = vector.shape_cast %3 : vector<1x128x128xf32> to vector<128x128xf32>
    %5 = arith.truncf %4 : vector<128x128xf32> to vector<128x128xbf16>
    %c0_3 = arith.constant 0 : index
    %c0_4 = arith.constant 0 : index
    %6 = vector.load %arg7[%c0_3, %c0_4] : memref<128x128xbf16, #tpu.memory_space<vmem>>, vector<128x128xbf16>
    %cst = arith.constant dense<0.000000e+00> : vector<128x128xf32>
    %7 = tpu.matmul %6, %5, %cst {dimension_numbers = #tpu.dot_dimension_numbers<[1], [1], [0], [0], [0, 0, 1, 0], [], []>} : vector<128x128xbf16>, vector<128x128xbf16>, vector<128x128xf32> -> vector<128x128xf32>
    %c0_5 = arith.constant 0 : index
    %c0_6 = arith.constant 0 : index
    %8 = vector.load %arg8[%c0_5, %c0_6] : memref<128x1xf32, #tpu.memory_space<vmem>>, vector<128x1xf32>
    %cst_7 = arith.constant dense<0xFF800000> : vector<128xf32>
    %9 = vector.multi_reduction <maximumf>, %7, %cst_7 [1] : vector<128x128xf32> to vector<128xf32>
    %10 = vector.shape_cast %9 : vector<128xf32> to vector<128x1xf32>
    %11 = arith.maximumf %8, %10 : vector<128x1xf32>
    %12 = arith.subf %8, %11 : vector<128x1xf32>
    %13 = math.exp %12 : vector<128x1xf32>
    %14 = vector.broadcast %11 : vector<128x1xf32> to vector<128x128xf32>
    %15 = arith.subf %7, %14 : vector<128x128xf32>
    %16 = math.exp %15 : vector<128x128xf32>
    %c0_8 = arith.constant 0 : index
    %c0_9 = arith.constant 0 : index
    %17 = vector.load %arg9[%c0_8, %c0_9] : memref<128x1xf32, #tpu.memory_space<vmem>>, vector<128x1xf32>
    %18 = arith.mulf %13, %17 : vector<128x1xf32>
    %cst_10 = arith.constant dense<0.000000e+00> : vector<128xf32>
    %19 = vector.multi_reduction <add>, %16, %cst_10 [1] : vector<128x128xf32> to vector<128xf32>
    %20 = vector.shape_cast %19 : vector<128xf32> to vector<128x1xf32>
    %21 = arith.addf %18, %20 : vector<128x1xf32>
    %c0_11 = arith.constant 0 : index
    %c0_12 = arith.constant 0 : index
    %22 = vector.load %arg9[%c0_11, %c0_12] : memref<128x1xf32, #tpu.memory_space<vmem>>, vector<128x1xf32>
    tpu.vector_store %arg9[%c0_11, %c0_12], %21 {strides = array<i32>} : memref<128x1xf32, #tpu.memory_space<vmem>>, vector<128x1xf32>,
    %c0_13 = arith.constant 0 : index
    %c0_14 = arith.constant 0 : index
    %23 = vector.load %arg10[%c0_13, %c0_14] : memref<128x128xf32, #tpu.memory_space<vmem>>, vector<128x128xf32>
    %24 = vector.broadcast %13 : vector<128x1xf32> to vector<128x128xf32>
    %25 = arith.mulf %24, %23 : vector<128x128xf32>
    %26 = arith.truncf %16 : vector<128x128xf32> to vector<128x128xbf16>
    %cst_15 = arith.constant dense<0.000000e+00> : vector<128x128xf32>
    %27 = tpu.matmul %26, %5, %cst_15 {dimension_numbers = #tpu.dot_dimension_numbers<[1], [0], [0], [1], [0, 0, 1, 1], [], []>} : vector<128x128xbf16>, vector<128x128xbf16>, vector<128x128xf32> -> vector<128x128xf32>
    %28 = arith.addf %25, %27 : vector<128x128xf32>
    %c0_16 = arith.constant 0 : index
    %c0_17 = arith.constant 0 : index
    %29 = vector.load %arg10[%c0_16, %c0_17] : memref<128x128xf32, #tpu.memory_space<vmem>>, vector<128x128xf32>
    tpu.vector_store %arg10[%c0_16, %c0_17], %28 {strides = array<i32>} : memref<128x128xf32, #tpu.memory_space<vmem>>, vector<128x128xf32>,
    %c0_18 = arith.constant 0 : index
    %c0_19 = arith.constant 0 : index
    %30 = vector.load %arg8[%c0_18, %c0_19] : memref<128x1xf32, #tpu.memory_space<vmem>>, vector<128x1xf32>
    tpu.vector_store %arg8[%c0_18, %c0_19], %11 {strides = array<i32>} : memref<128x1xf32, #tpu.memory_space<vmem>>, vector<128x1xf32>,
    %c1_i32 = arith.constant 1 : i32
    %31 = arith.cmpi eq, %arg2, %c1_i32 : i32
    %32 = arith.extui %31 : i1 to i32
    %c0_i32_20 = arith.constant 0 : i32
    %33 = arith.cmpi ne, %32, %c0_i32_20 : i32
    scf.if %33 {
      %c0_21 = arith.constant 0 : index
      %c0_22 = arith.constant 0 : index
      %34 = vector.load %arg10[%c0_21, %c0_22] : memref<128x128xf32, #tpu.memory_space<vmem>>, vector<128x128xf32>
      %c0_23 = arith.constant 0 : index
      %c0_24 = arith.constant 0 : index
      %35 = vector.load %arg9[%c0_23, %c0_24] : memref<128x1xf32, #tpu.memory_space<vmem>>, vector<128x1xf32>
      %36 = tpu.reciprocal %35 {approx = true} : vector<128x1xf32> -> vector<128x1xf32>
      %37 = vector.broadcast %36 : vector<128x1xf32> to vector<128x128xf32>
      %38 = arith.mulf %34, %37 : vector<128x128xf32>
      %c0_25 = arith.constant 0 : index
      %c0_26 = arith.constant 0 : index
      %c0_27 = arith.constant 0 : index
      %39 = vector.load %arg6[%c0_25, %c0_26, %c0_27] : memref<1x128x128xf32, #tpu.memory_space<vmem>>, vector<1x128x128xf32>
      %40 = vector.shape_cast %39 : vector<1x128x128xf32> to vector<128x128xf32>
      %41 = vector.shape_cast %38 : vector<128x128xf32> to vector<1x128x128xf32>
      tpu.vector_store %arg6[%c0_25, %c0_26, %c0_27], %41 {strides = array<i32>} : memref<1x128x128xf32, #tpu.memory_space<vmem>>, vector<1x128x128xf32>,
    } else {
    }
    return
  }
  func.func @transform_0(%arg0: i32, %arg1: i32, %arg2: i32) -> (i32, i32, i32) {
    %c0_i32 = arith.constant 0 : i32
    %c0_i32_0 = arith.constant 0 : i32
    return %arg0, %arg1, %c0_i32 : i32, i32, i32
  }
  func.func @transform_1(%arg0: i32, %arg1: i32, %arg2: i32) -> (i32, i32, i32) {
    %c0_i32 = arith.constant 0 : i32
    %c0_i32_0 = arith.constant 0 : i32
    return %arg0, %arg2, %c0_i32 : i32, i32, i32
  }
  func.func @transform_2(%arg0: i32, %arg1: i32, %arg2: i32) -> (i32, i32) {
    %c0_i32 = arith.constant 0 : i32
    %c0_i32_0 = arith.constant 0 : i32
    %c0_i32_1 = arith.constant 0 : i32
    return %c0_i32, %c0_i32_0 : i32, i32
  }
  func.func @transform_3(%arg0: i32, %arg1: i32, %arg2: i32) -> (i32, i32, i32) {
    %c0_i32 = arith.constant 0 : i32
    %c0_i32_0 = arith.constant 0 : i32
    return %arg0, %arg1, %c0_i32 : i32, i32, i32
  }
}

</mosaic_0001>

<bundles_post_ra>
// kernel: tpu_custom_call.1
= control target key start
LH: loop header
LB: loop body
LE: loop exit
PB: predicated region body
PF: predicated region fallthrough
CT: control target
= control target key end

     0   :  { %s3065_s0 = inlined_call_operand.hbm [shape: f32[2,256,128], index: 0, kind: input, shape index: {}]   ;;  %s3066_s1 = inlined_call_operand.hbm [shape: f32[2,256,128], index: 1, kind: input, shape index: {}]   ;;  %s3067_s2 = inlined_call_operand.hbm [shape: bf16[128,128], index: 2, kind: input, shape index: {}]   ;;  %s3068_s3 = inlined_call_operand.hbm [shape: f32[2,256,128], index: 3, kind: output, shape index: {}]  }
   0x1   :  { %3087 = sst [smem:[#allocation28_spill]] %s3067_s2 }
   0x2   :  { %3088 = sst [smem:[#allocation29_spill]] %s3068_s3 }
   0x3   :  { %8 = vsyncpa [#allocation7], 0 }
   0x4   :  { %10 = vsyncpa [#allocation7 + $0x1], 0 }
   0x5   :  { %11 = vsyncpa [#allocation10], 0 }
   0x6   :  { %13 = vsyncpa [#allocation10 + $0x1], 0 }
   0x7   :  { %14 = vsyncpa [#allocation8], 0 }
   0x8   :  { %16 = vsyncpa [#allocation8 + $0x1], 0  ;;  %s2288_s12 = smov 0   ;;  %s2290_s13 = smov 0  }
   0x9   :  { %s2292_s14 = smov 0   ;;  %s2294_s15 = smov 0  }
   0xa   :  { %s2296_s16 = smov 0   ;;  %s2298_s17 = smov 0  }
   0xb   :  { %s2300_s18 = smov 0   ;;  %s2302_s19 = smov 0  }
   0xc   :  { %s2304_s20 = smov 0   ;;  %s2306_s21 = smov 0  }
   0xd   :  { %s2308_s22 = smov 0   ;;  %s2310_s23 = smov 0  }
   0xe   :  { %s2312_s24 = smov 0  }
   0xf LB: > { %3089 = sst [smem:[#allocation17_spill]] %s2216_s15  ;;  %s2352_s25 = sadd.s32 4294967295, %s2252_s24   ;;  %s2252_s24 = sphi %s2312_s24, %s22_s24   ;;  %s2248_s23 = sphi %s2310_s23, %s3145_s23   ;;  %s2244_s22 = sphi %s2308_s22, %s3144_s22   ;;  %s2240_s21 = sphi %s2306_s21, %s3143_s21   ;;  %s2236_s20 = sphi %s2304_s20, %s3142_s20   ;;  %s2232_s19 = sphi %s2302_s19, %s3141_s19   ;;  %s2228_s18 = sphi %s2300_s18, %s3140_s18   ;;  %s2224_s17 = sphi %s2298_s17, %s3139_s17   ;;  %s2220_s16 = sphi %s2296_s16, %s3138_s16   ;;  %s2216_s15 = sphi %s2294_s15, %s3137_s15   ;;  %s2212_s14 = sphi %s2292_s14, %s3136_s14   ;;  %s2208_s13 = sphi %s2290_s13, %s3135_s13   ;;  %s2204_s12 = sphi %s2288_s12, %s3134_s12  }
  0x10   : > { %3090 = sst [smem:[#allocation18_spill]] %s2228_s18  ;;  %s1573_s26 = sadd.s32 4294967294, %s2252_s24  }
  0x11   : > { %3091 = sst [smem:[#allocation19_spill]] %s2232_s19  ;;  %p63_p0 = scmp.ne.s32.totalorder %s2220_s16, %s2216_s15 }
  0x12   : > { %3092 = sst [smem:[#allocation20_spill]] %s2236_s20  ;;  %p3069_p1 = scmp.eq.s32.totalorder %s2352_s25, 0 }
  0x13   : > { %3093 = sst [smem:[#allocation21_spill]] %s2352_s25  ;;  %p91_p2 = scmp.ne.s32.totalorder %s2208_s13, %s2204_s12 }
  0x14   : > { %p2362_p4 = por %p3069_p1, %p63_p0  ;;  %p144_p5 = scmp.eq.s32.totalorder %s1573_s26, 7 }
  0x15   : > { %p2368_p6 = por %p91_p2, %p3069_p1  ;;  %p1574_p7 = scmp.ge.s32.totalorder %s2252_s24, 1 }
  0x16   : > { %s3094_s27 = scalar_select %p2362_p4, 1, 0 }
  0x17   : > { %s3095_s28 = scalar_select %p2368_p6, 1, 0 }
  0x18   : > { %p2373_p8 = por %p144_p5, %p63_p0  ;;  %p151_p9 = scmp.lt.s32.totalorder %s2252_s24, 9 }
  0x19   : > { %3096 = sst [smem:[#allocation22_spill]] %s3095_s28  ;;  %s2254_s4 = smov [#allocation11]  }
  0x1a   : > { %s3097_s29 = scalar_select %p2373_p8, 1, 0 }
  0x1b   : > { %p2378_p10 = pnand %p1574_p7, %p151_p9  ;;  %s163_s5 = sshll.u32 %s2254_s4, 4  ;;  %s164_s5 = int_to_ptr.vmem [resolvable:$true] %s163_s5 }
  0x1c   : > { %3098 = sst [smem:[#allocation23_spill]] %s3097_s29  ;;  %s3101_s2 = sld [smem:[#allocation28_spill]] }
  0x1d   : > { %s3099_s30 = scalar_select %p2378_p10, 1, 0 }
  0x1e   : > { %p1776_p11 = pneg %p2378_p10 }
  0x20   : > { %p2386_p12 = pnand %p1776_p11, %p3069_p1 }
  0x22   : > { %s2018_s9 = scalar_lea.hbm %s3101_s2, 1024  ;;  %p2020_p0 = pneg %p2386_p12 }
  0x23   : > { %p2019_p13 = scmp.ne.s32.totalorder %s3101_s2, %s2018_s9  ;;  %p2025_p7 = scmp.lt.u32.totalorder %s2018_s9, %s3101_s2 }
  0x25   : > { %p2021_p2 = pnand %p2020_p0, %p2019_p13 }
  0x27   : > { %p2022_p5 = pneg %p2021_p2 }
  0x29   : > { %p2027_p9 = pnand %p2025_p7, %p2022_p5 }
  0x2b   : > { %2030 = shalt.err (!%p2027_p9)
}
  0x2c   : > { %s2031_s4 = scalar_lea.vmem %s164_s5, 1024  ;;  %p2039_p8 = scmp.lt.s32.totalorder %s164_s5, %s164_s5 }
  0x2d   : > { %p2032_p11 = scmp.ne.s32.totalorder %s164_s5, %s2031_s4  ;;  %p2040_p6 = scmp.lt.s32.totalorder %s2031_s4, %s2031_s4 }
  0x2f   : > { %p2034_p1 = pnand %p2032_p11, %p2020_p0  ;;  %p2041_p4 = por %p2040_p6, %p2039_p8 }
  0x31   : > { %p2035_p3 = pneg %p2034_p1 }
  0x33   : > { %p2042_p10 = pnand %p2041_p4, %p2035_p3 }
  0x35   : > { %2045 = shalt.err (!%p2042_p10)
}
  0x36   : > { %s2255_s7 = smov 64   ;;  %s2256_s8 = smov 4  }
  0x37   : > { %1779 = dma.hbm_to_vmem [thread:$0]  (!%p2386_p12), %s3101_s2, 1024, %s164_s5, [#allocation10], %s2255_s7, %s2255_s7, %s2256_s8  }
  0x38   : > { %s34_s11 = sadd.s32 1, %s2240_s21  ;;  %s37_s12 = sadd.s32 1, %s2244_s22 }
  0x39   : > { %p35_p1 = scmp.ge.s32.totalorder %s34_s11, 2  ;;  %s41_s26 = sadd.s32 1, %s2248_s23 }
  0x3a   : > { %s50_s4 = sadd.s32 1, %s2224_s17  ;;  %p57_p3 = scmp.ne.s32.totalorder %s2224_s17, %s2220_s16 }
  0x3b   : > { %s3147_s11 = smov (%p35_p1, %s34_s11), 0  ;;  %s3149_s12 = smov (!%p35_p1, %s37_s12), %s2244_s22 }
  0x3c   : > { %3102 = sst [smem:[#allocation24_spill]] %s3147_s11  ;;  %p3086_p4 = scmp.eq.s32.totalorder %s2252_s24, 0 }
  0x3d   : > { %p39_p6 = scmp.ge.s32.totalorder %s3149_s12, 2  ;;  %s74_s6 = ssub.s32 %s2240_s21, %s3147_s11 }
  0x3e   : > { %p2420_p8 = por %p3086_p4, %p57_p3  ;;  %p3104_p10 = scmp.eq.s32.totalorder %s2352_s25, 7 }
  0x3f   : > { %s3151_s12 = smov (%p39_p6, %s3149_s12), 0  ;;  %s3153_s26 = smov (!%p39_p6, %s41_s26), %s2248_s23 }
  0x40   : > { %p2426_p12 = por %p3104_p10, %p57_p3  ;;  %3107 = sst [smem:[#allocation26_spill]] %s3151_s12 }
  0x41   : > { %s46_s8 = ssub.s32 %s2244_s22, %s3151_s12  ;;  %p3085_p13 = scmp.lt.s32.totalorder %s2252_s24, 8 }
  0x42   : > { %s3105_s7 = scalar_select %p2426_p12, 1, 0 }
  0x43   : > { %p43_p0 = scmp.ge.s32.totalorder %s3153_s26, 2  ;;  %s177_s9 = sand.u32 1, %s2224_s17  }
  0x44   : > { %3106 = sst [smem:[#allocation25_spill]] %s3105_s7  ;;  %s1577_s10 = sshll.u32 %s177_s9, 7 }
  0x45   : > { %s3155_s26 = smov (%p43_p0, %s3153_s26), 0  ;;  %s1578_s2 = sshll.u32 %s2244_s22, 4 }
  0x46   : > { %3108 = sst [smem:[#allocation27_spill]] %s3155_s26  ;;  %s45_s11 = ssub.s32 %s2248_s23, %s3155_s26 }
  0x47   : > { %s1579_s29 = sshll.u32 %s2248_s23, 5  ;;  %s47_s15 = sor.u32 %s46_s8, %s45_s11 }
  0x48   : > { %s2443_s3 = sor.u32 %s74_s6, %s45_s11  ;;  %p48_p2 = scmp.eq.s32.totalorder %s47_s15, 0 }
  0x49   : > { %s187_s12 = sadd.s32 %s1579_s29, %s1578_s2  ;;  %s181_s7 = scalar_lea.vmem [#allocation6], %s1577_s10 }
  0x4a   : > { %s190_s20 = sshll.u32 %s181_s7, 4  ;;  %s1580_s18 = sshll.u32 %s187_s12, 7  ;;  %s2451_s20 = int_to_ptr.vmem [resolvable:$true] %s190_s20 }
  0x4b   : > { %s2449_s19 = scalar_select %p48_p2, %s2224_s17, %s50_s4  }
  0x4c   : > { %s2456_s26 = scalar_lea.hbm %s3065_s0, %s1580_s18  ;;  %p2462_p7 = pnand %p3085_p13, %p2420_p8 }
  0x4d   : > { %s1582_s15 = sshll.u32 %s2240_s21, 4  ;;  %s2467_s11 = scalar_lea.sflag [#allocation7], %s177_s9 }
  0x4e   : > { %s2046_s12 = scalar_lea.hbm %s2456_s26, 2048  ;;  %p2048_p11 = pneg %p2462_p7 }
  0x4f   : > { %p2047_p9 = scmp.ne.s32.totalorder %s2456_s26, %s2046_s12  ;;  %s2051_s28 = scalar_lea.hbm %s3065_s0, 8192 }
  0x50   : > { %p2052_p6 = scmp.lt.u32.totalorder %s2456_s26, %s3065_s0  ;;  %p2053_p8 = scmp.lt.u32.totalorder %s2051_s28, %s2046_s12 }
  0x51   : > { %p2049_p1 = pnand %p2048_p11, %p2047_p9  ;;  %p2055_p0 = scmp.lt.u32.totalorder %s2046_s12, %s2456_s26 }
  0x52   : > { %p2054_p10 = por %p2053_p8, %p2052_p6 }
  0x53   : > { %p2050_p3 = pneg %p2049_p1 }
  0x54   : > { %p2056_p2 = por %p2055_p0, %p2054_p10 }
  0x56   : > { %p2057_p13 = pnand %p2056_p2, %p2050_p3 }
  0x58   : > { %2060 = shalt.err (!%p2057_p13)
}
  0x59   : > { %s2061_s5 = scalar_lea.vmem %s2451_s20, 2048  ;;  %s2257_s7 = smov [#allocation6]  }
  0x5a   : > { %p2062_p9 = scmp.ne.s32.totalorder %s2451_s20, %s2061_s5  ;;  %s2066_s8 = sshll.u32 %s2257_s7, 4  ;;  %s2067_s8 = int_to_ptr.vmem [resolvable:$false] %s2066_s8 }
  0x5b   : > { %s2068_s9 = scalar_lea.vmem %s2067_s8, 4096  ;;  %p2069_p5 = scmp.lt.s32.totalorder %s2451_s20, %s2067_s8 }
  0x5c   : > { %p2064_p1 = pnand %p2062_p9, %p2048_p11  ;;  %p2070_p6 = scmp.lt.s32.totalorder %s2068_s9, %s2061_s5 }
  0x5e   : > { %p2065_p4 = pneg %p2064_p1  ;;  %p2071_p8 = por %p2070_p6, %p2069_p5 }
  0x60   : > { %p2072_p10 = pnand %p2071_p8, %p2065_p4 }
  0x62   : > { %2075 = shalt.err (!%p2072_p10)
}
  0x63   : > { %s2258_s10 = smov 128   ;;  %s2259_s12 = smov 8  }
  0x64   : > { %1783 = dma.hbm_to_vmem [thread:$0]  (!%p2462_p7), %s2456_s26, 2048, %s2451_s20, %s2467_s11, %s2258_s10, %s2258_s10, %s2259_s12  }
  0x65   : > { %s210_s18 = sadd.s32 %s1582_s15, %s1579_s29  ;;  %s78_s28 = sadd.s32 1, %s2212_s14 }
  0x66   : > { %s1584_s25 = sshll.u32 %s210_s18, 7  ;;  %p3110_p4 = scmp.eq.s32.totalorder %s2443_s3, 0 }
  0x67   : > { %p85_p13 = scmp.ne.s32.totalorder %s2212_s14, %s2208_s13  ;;  %s200_s6 = sand.u32 1, %s2252_s24  }
  0x68   : > { %s2506_s4 = scalar_select %p3110_p4, %s2212_s14, %s78_s28  }
  0x69   : > { %s2514_s8 = scalar_lea.hbm %s3066_s1, %s1584_s25  ;;  %s202_s2 = sand.u32 1, %s2212_s14  }
  0x6a   : > { %p3111_p5 = scmp.eq.s32.totalorder %s2252_s24, 0  ;;  %s1581_s20 = sshll.u32 %s202_s2, 7 }
  0x6b   : > { %s204_s29 = scalar_lea.vmem [#allocation9], %s1581_s20  ;;  %p3112_p11 = scmp.lt.s32.totalorder %s2252_s24, 8 }
  0x6c   : > { %p87_p7 = por %p85_p13, %p3111_p5  ;;  %s213_s26 = sshll.u32 %s204_s29, 4  ;;  %s2525_s26 = int_to_ptr.vmem [resolvable:$true] %s213_s26 }
  0x6d   : > { %s2527_s15 = scalar_lea.sflag [#allocation10], %s200_s6  ;;  %s2076_s11 = scalar_lea.hbm %s2514_s8, 2048 }
  0x6e   : > { %p2521_p3 = pnand %p3112_p11, %p87_p7  ;;  %p2077_p0 = scmp.ne.s32.totalorder %s2514_s8, %s2076_s11 }
  0x6f   : > { %s2081_s25 = scalar_lea.hbm %s3066_s1, 8192  ;;  %p2082_p6 = scmp.lt.u32.totalorder %s2514_s8, %s3066_s1 }
  0x70   : > { %p2078_p2 = pneg %p2521_p3  ;;  %p2083_p8 = scmp.lt.u32.totalorder %s2081_s25, %s2076_s11 }
  0x71   : > { %p2085_p4 = scmp.lt.u32.totalorder %s2076_s11, %s2514_s8 }
  0x72   : > { %p2079_p9 = pnand %p2078_p2, %p2077_p0  ;;  %p2084_p10 = por %p2083_p8, %p2082_p6 }
  0x74   : > { %p2080_p1 = pneg %p2079_p9  ;;  %p2086_p13 = por %p2085_p4, %p2084_p10 }
  0x76   : > { %p2087_p5 = pnand %p2086_p13, %p2080_p1 }
  0x78   : > { %2090 = shalt.err (!%p2087_p5)
}
  0x79   : > { %s2091_s6 = scalar_lea.vmem %s2525_s26, 2048  ;;  %s2260_s7 = smov [#allocation9]  }
  0x7a   : > { %p2092_p7 = scmp.ne.s32.totalorder %s2525_s26, %s2091_s6  ;;  %s2096_s2 = sshll.u32 %s2260_s7, 4  ;;  %s2097_s2 = int_to_ptr.vmem [resolvable:$false] %s2096_s2 }
  0x7b   : > { %s2098_s20 = scalar_lea.vmem %s2097_s2, 4096  ;;  %p2099_p9 = scmp.lt.s32.totalorder %s2525_s26, %s2097_s2 }
  0x7c   : > { %p2094_p11 = pnand %p2092_p7, %p2078_p2  ;;  %p2100_p6 = scmp.lt.s32.totalorder %s2098_s20, %s2091_s6 }
  0x7e   : > { %p2095_p0 = pneg %p2094_p11  ;;  %p2101_p8 = por %p2100_p6, %p2099_p9 }
  0x80   : > { %p2102_p10 = pnand %p2101_p8, %p2095_p0 }
  0x82   : > { %2105 = shalt.err (!%p2102_p10)
}
  0x83   : > { %1786 = dma.hbm_to_vmem [thread:$0]  (!%p2521_p3), %s2514_s8, 2048, %s2525_s26, %s2527_s15, %s2258_s10, %s2258_s10, %s2259_s12  }
  0x84   : > { %p3114_p2 = scmp.ne.s32.totalorder %s3099_s30, 0 }
  0x85   : > { %s2561_s29 = sand.u32 (!%p3114_p2), 1, %s2220_s16   ;;  %p3115_p1 = scmp.ne.s32.totalorder (!%p3114_p2), %s3094_s27, 0 }
  0x86   : > { %225 = sbr.rel (%p3114_p2) target bundleno = 1442 (0x5a2), region = 32  ;;  %s1586_s11 = sshll.u32 (!%p3114_p2), %s2561_s29, 7 }
  0x87   : > { %s228_s9 = scalar_lea.sflag (!%p3114_p2), [#allocation7], %s2561_s29  ;;  %s2565_s18 = scalar_lea.vmem (!%p3114_p2), [#allocation6], %s1586_s11 }
  0x8d   : > { %2187 = dma.done.wait (%p3115_p1), %s228_s9, 2048  }
  0x8e   : > { %2189 = vsyncadd (%p3115_p1), %s228_s9, 4294965248  ;;  %s3116_s3 = sld [smem:[#allocation21_spill]]  ;;  %s3117_s10 = sld [smem:[#allocation22_spill]] }
  0x8f   : > { %s238_s12 = sand.u32 1, %s2208_s13  }
  0x90   : > { %s1587_s8 = sshll.u32 %s238_s12, 7 }
  0x91   : > { %s2573_s15 = scalar_lea.vmem [#allocation9], %s1587_s8 }
  0x94   : > { %s236_s30 = sand.u32 1, %s3116_s3   ;;  %p3118_p3 = scmp.ne.s32.totalorder %s3117_s10, 0 }
  0x95   : > { %s237_s26 = scalar_lea.sflag [#allocation10], %s236_s30 }
  0x96   : > { %2191 = dma.done.wait (%p3118_p3), %s237_s26, 2048  }
  0x97   : > { %2193 = vsyncadd (%p3118_p3), %s237_s26, 4294965248  ;;  %p3119_p4 = scmp.eq.s32.totalorder %s3116_s3, 0 }
  0x99   : > { %2195 = dma.done.wait (%p3119_p4), [#allocation10], 1024   ;;  %p3120_p13 = pmov %p3119_p4 }
  0x9a   : > { %s2583_s27 = scalar_lea.vmem [#allocation12], %s1586_s11  ;;  %s3121_s25 = sld [smem:[#allocation18_spill]] }
  0x9b   : > { %2197 = vsyncadd (%p3120_p13), [#allocation10], 4294966272 }
  0xa0   : > { %p1590_p5 = scmp.ne.s32.totalorder %s3121_s25, 0 }
  0xa1   : > { %v1910_v0 = vld [vmem:[#allocation11] sm:$0xff] (!%p1590_p5)   ;;  %v1911_v1 = vld [vmem:[#allocation11 + $0x8] sm:$0xff] (!%p1590_p5)   ;;  %v1912_v2 = vld [vmem:[#allocation11 + $0x10] sm:$0xff] (!%p1590_p5)   ;;  %vm481_vm0 = vcmask (!%p1590_p5), 7168   ;;  %v2261_v32 = vmov (!%p1590_p5), -inf   ;;  %v2262_v33 = vmov (!%p1590_p5), 0.0  }
  0xa2   : > { %279 = sbr.rel (%p1590_p5) target bundleno = 452 (0x1c4), region = 48  ;;  %1654 = vmatprep.subr.bf16.mxu0 (!%p1590_p5), %v1910_v0  ;;  %1750 = vmatprep.subr.bf16.mxu1 (!%p1590_p5), %v1910_v0  ;;  %v280_v3 = vld [vmem:[%s2565_s18] sm:$0xff] (!%p1590_p5)  ;;  %v281_v4 = vld [vmem:[%s2565_s18 + $0x8] sm:$0xff] (!%p1590_p5)  ;;  %v1913_v9 = vld [vmem:[#allocation11 + $0x18] sm:$0xff] (!%p1590_p5)   ;;  %482 = vst.msk [vmem:[#allocation3] sm:$0xff] (!%p1590_p5), %vm481_vm0, %v2261_v32 }
  0xa3   : > { %1655 = vmatpush3.bf16.xpose.msra.mxu0 (!%p1590_p5), %v1910_v0  ;;  %1758 = vmatpush3.bf16.xpose.msra.mxu1 (!%p1590_p5), %v1910_v0  ;;  %v288_v5 = vld [vmem:[%s2565_s18 + $0x40] sm:$0xff] (!%p1590_p5)  ;;  %v296_v6 = vpack.c.bf16 (!%p1590_p5), %v281_v4, %v280_v3  ;;  %v289_v7 = vld [vmem:[%s2565_s18 + $0x48] sm:$0xff] (!%p1590_p5)  ;;  %v1916_v12 = vld [vmem:[#allocation11 + $0x30] sm:$0xff] (!%p1590_p5)   ;;  %483 = vst.msk [vmem:[#allocation3 + $0x8] sm:$0xff] (!%p1590_p5), %vm481_vm0, %v2261_v32 }
  0xa4   : > { %1656 = vmatprep.subr.bf16.mxu0 (!%p1590_p5), %v1911_v1  ;;  %1751 = vmatprep.subr.bf16.mxu1 (!%p1590_p5), %v1911_v1  ;;  %v300_v8 = vpack.c.bf16 (!%p1590_p5), %v289_v7, %v288_v5  ;;  %v1914_v10 = vld [vmem:[#allocation11 + $0x20] sm:$0xff] (!%p1590_p5)   ;;  %v1915_v11 = vld [vmem:[#allocation11 + $0x28] sm:$0xff] (!%p1590_p5)   ;;  %v1917_v13 = vld [vmem:[#allocation11 + $0x38] sm:$0xff] (!%p1590_p5)   ;;  %484 = vst.msk [vmem:[#allocation3 + $0x10] sm:$0xff] (!%p1590_p5), %vm481_vm0, %v2261_v32 }
  0xa5   : > { %1670 = vmatprep.mubr.bf16.mxu0 (!%p1590_p5), %v296_v6  ;;  %v282_v14 = vld [vmem:[%s2565_s18 + $0x10] sm:$0xff] (!%p1590_p5)  ;;  %v283_v15 = vld [vmem:[%s2565_s18 + $0x18] sm:$0xff] (!%p1590_p5)  ;;  %v284_v18 = vld [vmem:[%s2565_s18 + $0x20] sm:$0xff] (!%p1590_p5)  ;;  %485 = vst.msk [vmem:[#allocation3 + $0x18] sm:$0xff] (!%p1590_p5), %vm481_vm0, %v2261_v32 }
  0xa6   : > { %1678 = vmatprep.mubr.bf16.mxu1 (!%p1590_p5), %v300_v8  ;;  %v290_v16 = vld [vmem:[%s2565_s18 + $0x50] sm:$0xff] (!%p1590_p5)  ;;  %v291_v17 = vld [vmem:[%s2565_s18 + $0x58] sm:$0xff] (!%p1590_p5)  ;;  %v285_v19 = vld [vmem:[%s2565_s18 + $0x28] sm:$0xff] (!%p1590_p5)  ;;  %v297_v22 = vpack.c.bf16 (!%p1590_p5), %v283_v15, %v282_v14  ;;  %486 = vst.msk [vmem:[#allocation3 + $0x20] sm:$0xff] (!%p1590_p5), %vm481_vm0, %v2261_v32 }
  0xa7   : > { %v292_v20 = vld [vmem:[%s2565_s18 + $0x60] sm:$0xff] (!%p1590_p5)  ;;  %v293_v21 = vld [vmem:[%s2565_s18 + $0x68] sm:$0xff] (!%p1590_p5)  ;;  %v301_v23 = vpack.c.bf16 (!%p1590_p5), %v291_v17, %v290_v16  ;;  %v298_v24 = vpack.c.bf16 (!%p1590_p5), %v285_v19, %v284_v18  ;;  %v286_v26 = vld [vmem:[%s2565_s18 + $0x30] sm:$0xff] (!%p1590_p5)  ;;  %487 = vst.msk [vmem:[#allocation3 + $0x28] sm:$0xff] (!%p1590_p5), %vm481_vm0, %v2261_v32 }
  0xa8   : > { %v302_v25 = vpack.c.bf16 (!%p1590_p5), %v293_v21, %v292_v20  ;;  %v287_v27 = vld [vmem:[%s2565_s18 + $0x38] sm:$0xff] (!%p1590_p5)  ;;  %v294_v28 = vld [vmem:[%s2565_s18 + $0x70] sm:$0xff] (!%p1590_p5)  ;;  %488 = vst.msk [vmem:[#allocation3 + $0x30] sm:$0xff] (!%p1590_p5), %vm481_vm0, %v2261_v32  ;;  %489 = vst.msk [vmem:[#allocation3 + $0x38] sm:$0xff] (!%p1590_p5), %vm481_vm0, %v2261_v32 }
  0xa9   : > { %v295_v29 = vld [vmem:[%s2565_s18 + $0x78] sm:$0xff]  ;;  %v299_v30 = vpack.c.bf16 %v287_v27, %v286_v26  ;;  %490 = vst.msk [vmem:[#allocation3 + $0x40] sm:$0xff] %vm481_vm0, %v2261_v32  ;;  %491 = vst.msk [vmem:[#allocation3 + $0x48] sm:$0xff] %vm481_vm0, %v2261_v32 }
  0xaa   : > { %v303_v31 = vpack.c.bf16 %v295_v29, %v294_v28  ;;  %492 = vst.msk [vmem:[#allocation3 + $0x50] sm:$0xff] %vm481_vm0, %v2261_v32  ;;  %493 = vst.msk [vmem:[#allocation3 + $0x58] sm:$0xff] %vm481_vm0, %v2261_v32 }
  0xab   : > { %1657 = vmatpush3.bf16.xpose.msra.mxu0 %v1911_v1  ;;  %1759 = vmatpush3.bf16.xpose.msra.mxu1 %v1911_v1  ;;  %494 = vst.msk [vmem:[#allocation3 + $0x60] sm:$0xff] %vm481_vm0, %v2261_v32  ;;  %495 = vst.msk [vmem:[#allocation3 + $0x68] sm:$0xff] %vm481_vm0, %v2261_v32 }
  0xac   : > { %1658 = vmatprep.subr.bf16.mxu0 %v1912_v2  ;;  %1752 = vmatprep.subr.bf16.mxu1 %v1912_v2  ;;  %496 = vst.msk [vmem:[#allocation3 + $0x70] sm:$0xff] %vm481_vm0, %v2261_v32  ;;  %497 = vst.msk [vmem:[#allocation3 + $0x78] sm:$0xff] %vm481_vm0, %v2261_v32 }
  0xad   : > { %498 = vst.msk [vmem:[#allocation4] sm:$0xff] %vm481_vm0, %v2262_v33  ;;  %499 = vst.msk [vmem:[#allocation4 + $0x8] sm:$0xff] %vm481_vm0, %v2262_v33 }
  0xae   : > { %500 = vst.msk [vmem:[#allocation4 + $0x10] sm:$0xff] %vm481_vm0, %v2262_v33  ;;  %501 = vst.msk [vmem:[#allocation4 + $0x18] sm:$0xff] %vm481_vm0, %v2262_v33 }
  0xaf   : > { %502 = vst.msk [vmem:[#allocation4 + $0x20] sm:$0xff] %vm481_vm0, %v2262_v33  ;;  %503 = vst.msk [vmem:[#allocation4 + $0x28] sm:$0xff] %vm481_vm0, %v2262_v33 }
  0xb0   : > { %504 = vst.msk [vmem:[#allocation4 + $0x30] sm:$0xff] %vm481_vm0, %v2262_v33  ;;  %505 = vst.msk [vmem:[#allocation4 + $0x38] sm:$0xff] %vm481_vm0, %v2262_v33 }
  0xb1   : > { %506 = vst.msk [vmem:[#allocation4 + $0x40] sm:$0xff] %vm481_vm0, %v2262_v33  ;;  %507 = vst.msk [vmem:[#allocation4 + $0x48] sm:$0xff] %vm481_vm0, %v2262_v33 }
  0xb2   : > { %508 = vst.msk [vmem:[#allocation4 + $0x50] sm:$0xff] %vm481_vm0, %v2262_v33  ;;  %509 = vst.msk [vmem:[#allocation4 + $0x58] sm:$0xff] %vm481_vm0, %v2262_v33 }
  0xb3   : > { %1659 = vmatpush3.bf16.xpose.msra.mxu0 %v1912_v2  ;;  %1760 = vmatpush3.bf16.xpose.msra.mxu1 %v1912_v2  ;;  %510 = vst.msk [vmem:[#allocation4 + $0x60] sm:$0xff] %vm481_vm0, %v2262_v33  ;;  %511 = vst.msk [vmem:[#allocation4 + $0x68] sm:$0xff] %vm481_vm0, %v2262_v33 }
  0xb4   : > { %1660 = vmatprep.subr.bf16.mxu0 %v1913_v9  ;;  %1753 = vmatprep.subr.bf16.mxu1 %v1913_v9  ;;  %512 = vst.msk [vmem:[#allocation4 + $0x70] sm:$0xff] %vm481_vm0, %v2262_v33  ;;  %513 = vst.msk [vmem:[#allocation4 + $0x78] sm:$0xff] %vm481_vm0, %v2262_v33 }
  0xb5   : > { %514 = vst [vmem:[#allocation5] sm:$0xff] %v2262_v33  ;;  %515 = vst [vmem:[#allocation5 + $0x8] sm:$0xff] %v2262_v33 }
  0xb6   : > { %516 = vst [vmem:[#allocation5 + $0x10] sm:$0xff] %v2262_v33  ;;  %517 = vst [vmem:[#allocation5 + $0x18] sm:$0xff] %v2262_v33 }
  0xb7   : > { %518 = vst [vmem:[#allocation5 + $0x20] sm:$0xff] %v2262_v33  ;;  %519 = vst [vmem:[#allocation5 + $0x28] sm:$0xff] %v2262_v33 }
  0xb8   : > { %520 = vst [vmem:[#allocation5 + $0x30] sm:$0xff] %v2262_v33  ;;  %521 = vst [vmem:[#allocation5 + $0x38] sm:$0xff] %v2262_v33 }
  0xb9   : > { %522 = vst [vmem:[#allocation5 + $0x40] sm:$0xff] %v2262_v33  ;;  %523 = vst [vmem:[#allocation5 + $0x48] sm:$0xff] %v2262_v33 }
  0xba   : > { %524 = vst [vmem:[#allocation5 + $0x50] sm:$0xff] %v2262_v33  ;;  %525 = vst [vmem:[#allocation5 + $0x58] sm:$0xff] %v2262_v33 }
  0xbb   : > { %1661 = vmatpush3.bf16.xpose.msra.mxu0 %v1913_v9  ;;  %1761 = vmatpush3.bf16.xpose.msra.mxu1 %v1913_v9  ;;  %526 = vst [vmem:[#allocation5 + $0x60] sm:$0xff] %v2262_v33  ;;  %527 = vst [vmem:[#allocation5 + $0x68] sm:$0xff] %v2262_v33 }
  0xbc   : > { %1662 = vmatprep.subr.bf16.mxu0 %v1914_v10  ;;  %1754 = vmatprep.subr.bf16.mxu1 %v1914_v10  ;;  %528 = vst [vmem:[#allocation5 + $0x70] sm:$0xff] %v2262_v33  ;;  %529 = vst [vmem:[#allocation5 + $0x78] sm:$0xff] %v2262_v33 }
  0xc3   : > { %1663 = vmatpush3.bf16.xpose.msra.mxu0 %v1914_v10  ;;  %1762 = vmatpush3.bf16.xpose.msra.mxu1 %v1914_v10 }
  0xc4   : > { %1664 = vmatprep.subr.bf16.mxu0 %v1915_v11  ;;  %1755 = vmatprep.subr.bf16.mxu1 %v1915_v11 }
  0xcb   : > { %1665 = vmatpush3.bf16.xpose.msra.mxu0 %v1915_v11  ;;  %1763 = vmatpush3.bf16.xpose.msra.mxu1 %v1915_v11 }
  0xcc   : > { %1666 = vmatprep.subr.bf16.mxu0 %v1916_v12  ;;  %1756 = vmatprep.subr.bf16.mxu1 %v1916_v12 }
  0xd3   : > { %1667 = vmatpush3.bf16.xpose.msra.mxu0 %v1916_v12  ;;  %1764 = vmatpush3.bf16.xpose.msra.mxu1 %v1916_v12 }
  0xd4   : > { %1668 = vmatprep.subr.bf16.mxu0 %v1917_v13  ;;  %1757 = vmatprep.subr.bf16.mxu1 %v1917_v13 }
  0xdb   : > { %1669 = vmatpush3.bf16.xpose.msra.mxu0 %v1917_v13  ;;  %1765 = vmatpush3.bf16.xpose.msra.mxu1 %v1917_v13 }
  0xe2   : > { %1671 = vmatmul.mubr.bf16.vlgmr.msra.gmra.mrb[0].mxu0 %v297_v22  ;;  %1679 = vmatmul.mubr.bf16.vlgmr.msra.gmra.mrb[0].mxu1 %v301_v23 }
  0xe3   : > { %1674 = vmatprep.mubr.bf16.mxu0 %v298_v24  ;;  %1682 = vmatprep.mubr.bf16.mxu1 %v302_v25 }
  0xea   : > { %1675 = vmatmul.mubr.bf16.gmra.mrb[4].mxu0 %v299_v30  ;;  %1683 = vmatmul.mubr.bf16.gmra.mrb[4].mxu1 %v303_v31 }
 0x1b5   : > { %v1672_v34 = vpop.f32.mrb[0].mxu0  ;;  %v1680_v35 = vpop.f32.mrb[0].mxu1 }
 0x1b6   : > { %v402_v36 = vpop.f32.mrb[1].mxu0  ;;  %v434_v37 = vpop.f32.mrb[1].mxu1 }
 0x1b7   : > { %v1673_v38 = vpop.f32.mrb[2].mxu0  ;;  %v1681_v39 = vpop.f32.mrb[2].mxu1 }
 0x1b8   : > { %v466_v40 = vpack.c.bf16 %v1673_v38, %v1672_v34  ;;  %v470_v41 = vpack.c.bf16 %v1681_v39, %v1680_v35  ;;  %v405_v42 = vpop.f32.mrb[3].mxu0  ;;  %v437_v43 = vpop.f32.mrb[3].mxu1 }
 0x1b9   : > { %v465_v44 = vpack.c.bf16 %v405_v42, %v402_v36  ;;  %v469_v45 = vpack.c.bf16 %v437_v43, %v434_v37 }
 0x1ba   : > { %474 = vst [vmem:[#allocation2 + $0x8] sm:$0xff] %v466_v40  ;;  %478 = vst [vmem:[#allocation2 + $0x28] sm:$0xff] %v470_v41 }
 0x1bb   : > { %473 = vst [vmem:[#allocation2] sm:$0xff] %v465_v44  ;;  %477 = vst [vmem:[#allocation2 + $0x20] sm:$0xff] %v469_v45 }
 0x1bd   : > { %v1676_v46 = vpop.f32.mrb[4].mxu0  ;;  %v1684_v47 = vpop.f32.mrb[4].mxu1 }
 0x1be   : > { %v418_v48 = vpop.f32.mrb[5].mxu0  ;;  %v450_v49 = vpop.f32.mrb[5].mxu1 }
 0x1bf   : > { %v1677_v50 = vpop.f32.mrb[6].mxu0  ;;  %v1685_v51 = vpop.f32.mrb[6].mxu1 }
 0x1c0   : > { %v468_v52 = vpack.c.bf16 %v1677_v50, %v1676_v46  ;;  %v472_v53 = vpack.c.bf16 %v1685_v51, %v1684_v47  ;;  %v421_v54 = vpop.f32.mrb[7].mxu0  ;;  %v453_v55 = vpop.f32.mrb[7].mxu1 }
 0x1c1   : > { %v467_v56 = vpack.c.bf16 %v421_v54, %v418_v48  ;;  %v471_v57 = vpack.c.bf16 %v453_v55, %v450_v49 }
 0x1c2   : > { %476 = vst [vmem:[#allocation2 + $0x18] sm:$0xff] %v468_v52  ;;  %480 = vst [vmem:[#allocation2 + $0x38] sm:$0xff] %v472_v53 }
 0x1c3   : > { %475 = vst [vmem:[#allocation2 + $0x10] sm:$0xff] %v467_v56  ;;  %479 = vst [vmem:[#allocation2 + $0x30] sm:$0xff] %v471_v57 }
 0x1c4 PF: > { %v530_v58 = vld [vmem:[%s2573_s15] sm:$0xff]  ;;  %v531_v59 = vld [vmem:[%s2573_s15 + $0x8] sm:$0xff]  ;;  %v532_v60 = vld [vmem:[%s2573_s15 + $0x10] sm:$0xff]  ;;  %v2263_v35 = vmov 0   ;;  %vm979_vm1 = vcmask 7168   ;;  %s3122_s28 = sld [smem:[#allocation18_spill]] }
 0x1c5   : > { %v546_v61 = vpack.c.bf16 %v531_v59, %v530_v58  ;;  %v533_v62 = vld [vmem:[%s2573_s15 + $0x18] sm:$0xff]  ;;  %v534_v0 = vld [vmem:[%s2573_s15 + $0x20] sm:$0xff]  ;;  %v535_v1 = vld [vmem:[%s2573_s15 + $0x28] sm:$0xff]  ;;  %1919 = vset.pattern.permute.xlu1 %v2263_v35  ;;  %1918 = vset.pattern.permute.xlu0 %v2263_v35 }
 0x1c6   : > { %v547_v63 = vpack.c.bf16 %v533_v62, %v532_v60  ;;  %v554_v2 = vld [vmem:[#allocation2] sm:$0xff]  ;;  %v548_v3 = vpack.c.bf16 %v535_v1, %v534_v0  ;;  %v536_v4 = vld [vmem:[%s2573_s15 + $0x30] sm:$0xff]  ;;  %v537_v5 = vld [vmem:[%s2573_s15 + $0x38] sm:$0xff] }
 0x1c7   : > { %1686 = vmatprep.subr.bf16.mxu0 %v546_v61  ;;  %1718 = vmatprep.subr.bf16.mxu1 %v546_v61  ;;  %v549_v6 = vpack.c.bf16 %v537_v5, %v536_v4  ;;  %v538_v7 = vld [vmem:[%s2573_s15 + $0x40] sm:$0xff]  ;;  %v539_v8 = vld [vmem:[%s2573_s15 + $0x48] sm:$0xff]  ;;  %v540_v10 = vld [vmem:[%s2573_s15 + $0x50] sm:$0xff] }
 0x1c8   : > { %1687 = vmatpush3.bf16.xpose.msra.mxu0 %v546_v61  ;;  %1719 = vmatpush3.bf16.msra.mxu1 %v546_v61  ;;  %v550_v9 = vpack.c.bf16 %v539_v8, %v538_v7  ;;  %v541_v11 = vld [vmem:[%s2573_s15 + $0x58] sm:$0xff]  ;;  %v542_v13 = vld [vmem:[%s2573_s15 + $0x60] sm:$0xff]  ;;  %v543_v14 = vld [vmem:[%s2573_s15 + $0x68] sm:$0xff] }
 0x1c9   : > { %1688 = vmatprep.subr.bf16.mxu0 %v547_v63  ;;  %1720 = vmatprep.subr.bf16.mxu1 %v547_v63  ;;  %v551_v12 = vpack.c.bf16 %v541_v11, %v540_v10  ;;  %v552_v15 = vpack.c.bf16 %v543_v14, %v542_v13  ;;  %v544_v16 = vld [vmem:[%s2573_s15 + $0x70] sm:$0xff]  ;;  %v545_v17 = vld [vmem:[%s2573_s15 + $0x78] sm:$0xff]  ;;  %v555_v19 = vld [vmem:[#allocation2 + $0x8] sm:$0xff] }
 0x1ca   : > { %1702 = vmatprep.mubr.bf16.mxu0 %v554_v2  ;;  %v553_v18 = vpack.c.bf16 %v545_v17, %v544_v16  ;;  %v556_v20 = vld [vmem:[#allocation2 + $0x10] sm:$0xff]  ;;  %v557_v21 = vld [vmem:[#allocation2 + $0x18] sm:$0xff]  ;;  %v558_v22 = vld [vmem:[#allocation2 + $0x20] sm:$0xff]  ;;  %p1599_p7 = scmp.ne.s32.totalorder %s3122_s28, 1 }
 0x1cb   : > { %v559_v23 = vld [vmem:[#allocation2 + $0x28] sm:$0xff]  ;;  %v560_v24 = vld [vmem:[#allocation2 + $0x30] sm:$0xff]  ;;  %v561_v25 = vld [vmem:[#allocation2 + $0x38] sm:$0xff] }
 0x1cc   : > { %1721 = vmatpush3.bf16.msra.mxu1 %v547_v63  ;;  %v2698_v43 = vld [vmem:[#allocation3 + $0x10] sm:$0xff]  ;;  %v659_v44 = vld [vmem:[#allocation3] sm:$0xff]  ;;  %v2703_v49 = vld [vmem:[#allocation3 + $0x18] sm:$0xff] }
 0x1cd   : > { %1722 = vmatprep.subr.bf16.mxu1 %v548_v3  ;;  %v2708_v50 = vld [vmem:[#allocation3 + $0x8] sm:$0xff]  ;;  %v2716_v55 = vld [vmem:[#allocation3 + $0x20] sm:$0xff]  ;;  %v2720_v56 = vld [vmem:[#allocation3 + $0x38] sm:$0xff] }
 0x1ce   : > { %v2729_v61 = vld [vmem:[#allocation3 + $0x30] sm:$0xff]  ;;  %v664_v62 = vld [vmem:[#allocation3 + $0x28] sm:$0xff]  ;;  %v2743_v4 = vld [vmem:[#allocation3 + $0x58] sm:$0xff] }
 0x1cf   : > { %v2757_v10 = vld [vmem:[#allocation3 + $0x48] sm:$0xff]  ;;  %v2765_v16 = vld [vmem:[#allocation3 + $0x60] sm:$0xff]  ;;  %v2769_v17 = vld [vmem:[#allocation3 + $0x78] sm:$0xff] }
 0x1d0   : > { %1689 = vmatpush3.bf16.xpose.msra.mxu0 %v547_v63  ;;  %1723 = vmatpush3.bf16.msra.mxu1 %v548_v3 }
 0x1d1   : > { %1690 = vmatprep.subr.bf16.mxu0 %v548_v3  ;;  %1724 = vmatprep.subr.bf16.mxu1 %v549_v6 }
 0x1d4   : > { %1725 = vmatpush3.bf16.msra.mxu1 %v549_v6 }
 0x1d5   : > { %1726 = vmatprep.subr.bf16.mxu1 %v550_v9 }
 0x1d8   : > { %1691 = vmatpush3.bf16.xpose.msra.mxu0 %v548_v3  ;;  %1727 = vmatpush3.bf16.msra.mxu1 %v550_v9  ;;  %v2738_v3 = vld [vmem:[#allocation3 + $0x40] sm:$0xff] }
 0x1d9   : > { %1692 = vmatprep.subr.bf16.mxu0 %v549_v6  ;;  %1728 = vmatprep.subr.bf16.mxu1 %v551_v12 }
 0x1dc   : > { %1729 = vmatpush3.bf16.msra.mxu1 %v551_v12 }
 0x1dd   : > { %1730 = vmatprep.subr.bf16.mxu1 %v552_v15 }
 0x1e0   : > { %1693 = vmatpush3.bf16.xpose.msra.mxu0 %v549_v6  ;;  %1731 = vmatpush3.bf16.msra.mxu1 %v552_v15 }
 0x1e1   : > { %1694 = vmatprep.subr.bf16.mxu0 %v550_v9  ;;  %1732 = vmatprep.subr.bf16.mxu1 %v553_v18 }
 0x1e4   : > { %1733 = vmatpush3.bf16.msra.mxu1 %v553_v18 }
 0x1e8   : > { %1695 = vmatpush3.bf16.xpose.msra.mxu0 %v550_v9  ;;  %v2752_v9 = vld [vmem:[#allocation3 + $0x50] sm:$0xff] }
 0x1e9   : > { %1696 = vmatprep.subr.bf16.mxu0 %v551_v12 }
 0x1f0   : > { %1697 = vmatpush3.bf16.xpose.msra.mxu0 %v551_v12 }
 0x1f1   : > { %1698 = vmatprep.subr.bf16.mxu0 %v552_v15 }
 0x1f8   : > { %1699 = vmatpush3.bf16.xpose.msra.mxu0 %v552_v15 }
 0x1f9   : > { %1700 = vmatprep.subr.bf16.mxu0 %v553_v18 }
 0x200   : > { %1701 = vmatpush3.bf16.xpose.msra.mxu0 %v553_v18 }
 0x207   : > { %1703 = vmatmul.mubr.bf16.vlgmr.msra.gmra.mrb[0].mxu0 %v555_v19 }
 0x208   : > { %1706 = vmatprep.mubr.bf16.mxu0 %v556_v20 }
 0x20f   : > { %1707 = vmatmul.mubr.bf16.gmra.mrb[4].mxu0 %v557_v21 }
 0x210   : > { %1710 = vmatprep.mubr.bf16.mxu0 %v558_v22 }
 0x217   : > { %1711 = vmatmul.mubr.bf16.gmra.mrb[8].mxu0 %v559_v23 }
 0x218   : > { %1714 = vmatprep.mubr.bf16.mxu0 %v560_v24  ;;  %v2779_v24 = vld [vmem:[#allocation3 + $0x70] sm:$0xff] }
 0x21f   : > { %1715 = vmatmul.mubr.bf16.gmra.mrb[12].mxu0 %v561_v25  ;;  %v672_v25 = vld [vmem:[#allocation3 + $0x68] sm:$0xff] }
 0x2da   : > { %v2650_v26 = vpop.f32.mrb[0].mxu0 }
 0x2db   : > { %679 = vmax.xlane.f32.xlu1 %v2650_v26  ;;  %v2653_v27 = vpop.f32.mrb[1].mxu0 }
 0x2dc   : > { %675 = vmax.xlane.f32.xlu0 %v2653_v27  ;;  %v2656_v28 = vpop.f32.mrb[2].mxu0 }
 0x2dd   : > { %v2658_v29 = vpop.f32.mrb[3].mxu0 }
 0x2df   : > { %681 = vmax.xlane.f32.xlu1 %v2656_v28 }
 0x2e0   : > { %677 = vmax.xlane.f32.xlu0 %v2658_v29 }
 0x2e2   : > { %v2662_v30 = vpop.f32.mrb[4].mxu0 }
 0x2e3   : > { %v2664_v31 = vpop.f32.mrb[5].mxu0 }
 0x2e4   : > { %683 = vmax.xlane.f32.xlu0 %v2664_v31  ;;  %v2667_v32 = vpop.f32.mrb[6].mxu0 }
 0x2e5   : > { %689 = vmax.xlane.f32.xlu1 %v2667_v32  ;;  %v2670_v33 = vpop.f32.mrb[7].mxu0 }
 0x2e8   : > { %687 = vmax.xlane.f32.xlu0 %v2662_v30 }
 0x2e9   : > { %685 = vmax.xlane.f32.xlu1 %v2670_v33 }
 0x2ea   : > { %v2674_v34 = vpop.f32.mrb[8].mxu0 }
 0x2eb   : > { %v2676_v36 = vpop.f32.mrb[9].mxu0 }
 0x2ec   : > { %v2678_v37 = vpop.f32.mrb[10].mxu0  ;;  %691 = vmax.xlane.f32.xlu0 %v2676_v36 }
 0x2ed   : > { %697 = vmax.xlane.f32.xlu1 %v2678_v37  ;;  %v2682_v38 = vpop.f32.mrb[11].mxu0 }
 0x2f0   : > { %695 = vmax.xlane.f32.xlu0 %v2674_v34 }
 0x2f1   : > { %693 = vmax.xlane.f32.xlu1 %v2682_v38 }
 0x2f2   : > { %v2686_v39 = vpop.f32.mrb[12].mxu0 }
 0x2f3   : > { %v2688_v40 = vpop.f32.mrb[13].mxu0 }
 0x2f4   : > { %v2690_v41 = vpop.f32.mrb[14].mxu0  ;;  %699 = vmax.xlane.f32.xlu0 %v2688_v40 }
 0x2f5   : > { %705 = vmax.xlane.f32.xlu1 %v2690_v41  ;;  %v2694_v42 = vpop.f32.mrb[15].mxu0 }
 0x2f8   : > { %703 = vmax.xlane.f32.xlu0 %v2686_v39 }
 0x2f9   : > { %701 = vmax.xlane.f32.xlu1 %v2694_v42 }
 0x368   : > { %v680_v45 = vpop.xlane.xlu1 %679 }
 0x369   : > { %v2701_v46 = vmax.f32 %v2698_v43, %v680_v45  ;;  %v676_v47 = vpop.xlane.xlu0 %675 }
 0x36a   : > { %v707_v48 = vmax.f32 %v659_v44, %v676_v47 }
 0x36b   : > { %1247 = vst.msk [vmem:[#allocation3 + $0x10] sm:$0xff] %vm979_vm1, %v2701_v46  ;;  %783 = vperm.xlu1 %1919, %v2701_v46  }
 0x36c   : > { %1245 = vst.msk [vmem:[#allocation3] sm:$0xff] %vm979_vm1, %v707_v48  ;;  %v682_v51 = vpop.xlane.xlu1 %681  ;;  %773 = vperm.xlu0 %1918, %v707_v48   ;;  %v723_v12 = vsub.f32 %v659_v44, %v707_v48 }
 0x36d   : > { %v710_v52 = vmax.f32 %v2703_v49, %v682_v51  ;;  %v678_v53 = vpop.xlane.xlu0 %677 }
 0x36e   : > { %v2713_v54 = vmax.f32 %v2708_v50, %v678_v53  ;;  %v739_v19 = vmul.f32 1.442695, %v723_v12  ;;  %v725_v53 = vsub.f32 %v2698_v43, %v2701_v46 }
 0x36f   : > { %1248 = vst.msk [vmem:[#allocation3 + $0x18] sm:$0xff] %vm979_vm1, %v710_v52  ;;  %788 = vperm.xlu1 %1919, %v710_v52   ;;  %v726_v20 = vsub.f32 %v2703_v49, %v710_v52 }
 0x370   : > { %1246 = vst.msk [vmem:[#allocation3 + $0x8] sm:$0xff] %vm979_vm1, %v2713_v54  ;;  %v724_v35 = vsub.f32 %v2708_v50, %v2713_v54  ;;  %1920 = vpow2.f32 %v739_v19 }
 0x371   : > { %v684_v57 = vpop.xlane.xlu0 %683  ;;  %v745_v47 = vmul.f32 1.442695, %v726_v20 }
 0x372   : > { %v2723_v58 = vmax.f32 %v2716_v55, %v684_v57  ;;  %v690_v59 = vpop.xlane.xlu1 %689 }
 0x373   : > { %v2726_v60 = vmax.f32 %v2720_v56, %v690_v59  ;;  %778 = vperm.xlu1 %1919, %v2713_v54   ;;  %v741_v54 = vmul.f32 1.442695, %v724_v35  ;;  %1922 = vpow2.f32 %v745_v47 }
 0x374   : > { %1249 = vst.msk [vmem:[#allocation3 + $0x20] sm:$0xff] %vm979_vm1, %v2723_v58 }
 0x375   : > { %1252 = vst.msk [vmem:[#allocation3 + $0x38] sm:$0xff] %vm979_vm1, %v2726_v60  ;;  %v688_v63 = vpop.xlane.xlu0 %687  ;;  %v730_v57 = vsub.f32 %v2720_v56, %v2726_v60  ;;  %1924 = vpow2.f32 %v741_v54 }
 0x376   : > { %v2736_v0 = vmax.f32 %v2729_v61, %v688_v63  ;;  %v686_v1 = vpop.xlane.xlu1 %685  ;;  %v727_v63 = vsub.f32 %v2716_v55, %v2723_v58 }
 0x377   : > { %v712_v2 = vmax.f32 %v664_v62, %v686_v1  ;;  %v753_v1 = vmul.f32 1.442695, %v730_v57 }
 0x378   : > { %1251 = vst.msk [vmem:[#allocation3 + $0x30] sm:$0xff] %vm979_vm1, %v2736_v0  ;;  %803 = vperm.xlu1 %1919, %v2736_v0   ;;  %v747_v56 = vmul.f32 1.442695, %v727_v63 }
 0x379   : > { %1250 = vst.msk [vmem:[#allocation3 + $0x28] sm:$0xff] %vm979_vm1, %v712_v2  ;;  %v692_v5 = vpop.xlane.xlu0 %691  ;;  %v728_v48 = vsub.f32 %v664_v62, %v712_v2  ;;  %v743_v62 = vmul.f32 1.442695, %v725_v53 }
 0x37a   : > { %v698_v6 = vpop.xlane.xlu1 %697  ;;  %v2747_v7 = vmax.f32 %v2738_v3, %v692_v5  ;;  %v2810_v46 = vpop.eup %1920 }
 0x37b   : > { %v2750_v8 = vmax.f32 %v2743_v4, %v698_v6  ;;  %v749_v59 = vmul.f32 1.442695, %v728_v48 }
 0x37c   : > { %1253 = vst.msk [vmem:[#allocation3 + $0x40] sm:$0xff] %vm979_vm1, %v2747_v7  ;;  %793 = vperm.xlu1 %1919, %v2723_v58  }
 0x37d   : > { %1256 = vst.msk [vmem:[#allocation3 + $0x58] sm:$0xff] %vm979_vm1, %v2750_v8  ;;  %v696_v11 = vpop.xlane.xlu0 %695  ;;  %1926 = vpow2.f32 %v749_v59  ;;  %v734_v43 = vsub.f32 %v2743_v4, %v2750_v8 }
 0x37e   : > { %v694_v13 = vpop.xlane.xlu1 %693  ;;  %v2762_v14 = vmax.f32 %v2752_v9, %v696_v11  ;;  %1928 = vpow2.f32 %v743_v62 }
 0x37f   : > { %v716_v15 = vmax.f32 %v2757_v10, %v694_v13  ;;  %1930 = vpow2.f32 %v753_v1  ;;  %v761_v55 = vmul.f32 1.442695, %v734_v43 }
 0x380   : > { %1255 = vst.msk [vmem:[#allocation3 + $0x50] sm:$0xff] %vm979_vm1, %v2762_v14  ;;  %798 = vperm.xlu1 %1919, %v712_v2   ;;  %v2817_v2 = vpop.eup %1922  ;;  %1932 = vpow2.f32 %v747_v56  ;;  %v733_v5 = vsub.f32 %v2752_v9, %v2762_v14 }
 0x381   : > { %1254 = vst.msk [vmem:[#allocation3 + $0x48] sm:$0xff] %vm979_vm1, %v716_v15  ;;  %818 = vperm.xlu0 %1918, %v716_v15   ;;  %v700_v18 = vpop.xlane.xlu0 %699  ;;  %v732_v58 = vsub.f32 %v2757_v10, %v716_v15  ;;  %1934 = vpow2.f32 %v761_v55  ;;  %v731_v10 = vsub.f32 %v2738_v3, %v2747_v7 }
 0x382   : > { %v706_v21 = vpop.xlane.xlu1 %705  ;;  %v2774_v22 = vmax.f32 %v2765_v16, %v700_v18  ;;  %v759_v11 = vmul.f32 1.442695, %v733_v5 }
 0x383   : > { %v2777_v23 = vmax.f32 %v2769_v17, %v706_v21  ;;  %v757_v6 = vmul.f32 1.442695, %v732_v58 }
 0x384   : > { %1257 = vst.msk [vmem:[#allocation3 + $0x60] sm:$0xff] %vm979_vm1, %v2774_v22  ;;  %808 = vperm.xlu1 %1919, %v2726_v60   ;;  %v729_v60 = vsub.f32 %v2729_v61, %v2736_v0  ;;  %v2823_v0 = vpop.eup %1924  ;;  %v735_v15 = vsub.f32 %v2765_v16, %v2774_v22 }
 0x385   : > { %v738_v44 = vsub.f32 %v2769_v17, %v2777_v23  ;;  %1260 = vst.msk [vmem:[#allocation3 + $0x78] sm:$0xff] %vm979_vm1, %v2777_v23  ;;  %828 = vperm.xlu0 %1918, %v2750_v8   ;;  %v704_v45 = vpop.xlane.xlu0 %703 }
 0x386   : > { %v702_v49 = vpop.xlane.xlu1 %701  ;;  %v2792_v51 = vmax.f32 %v2779_v24, %v704_v45  ;;  %v751_v4 = vmul.f32 1.442695, %v729_v60  ;;  %v763_v18 = vmul.f32 1.442695, %v735_v15 }
 0x387   : > { %v720_v52 = vmax.f32 %v672_v25, %v702_v49  ;;  %v2825_v8 = vpop.eup %1926 }
 0x388   : > { %v737_v50 = vsub.f32 %v2779_v24, %v2792_v51  ;;  %1259 = vst.msk [vmem:[#allocation3 + $0x70] sm:$0xff] %vm979_vm1, %v2792_v51  ;;  %813 = vperm.xlu1 %1919, %v2747_v7   ;;  %1936 = vpow2.f32 %v751_v4  ;;  %v2831_v12 = vpop.eup %1928 }
 0x389   : > { %1258 = vst.msk [vmem:[#allocation3 + $0x68] sm:$0xff] %vm979_vm1, %v720_v52  ;;  %838 = vperm.xlu0 %1918, %v720_v52   ;;  %v736_v61 = vsub.f32 %v672_v25, %v720_v52  ;;  %1938 = vpow2.f32 %v757_v6  ;;  %v2833_v13 = vpop.eup %1930 }
 0x38a   : > { %1940 = vpow2.f32 %v759_v11  ;;  %v2839_v3 = vpop.eup %1932 }
 0x38b   : > { %v765_v9 = vmul.f32 1.442695, %v736_v61  ;;  %v2841_v7 = vpop.eup %1934 }
 0x38c   : > { %823 = vperm.xlu1 %1919, %v2762_v14   ;;  %v755_v14 = vmul.f32 1.442695, %v731_v10 }
 0x38d   : > { %848 = vperm.xlu0 %1918, %v2777_v23   ;;  %1942 = vpow2.f32 %v765_v9 }
 0x38e   : > { %1944 = vpow2.f32 %v755_v14 }
 0x38f   : > { %1946 = vpow2.f32 %v763_v18 }
 0x390   : > { %833 = vperm.xlu1 %1919, %v2774_v22  }
 0x391   : > { %1014 = vperm.xlu0 %1918, %v2810_v46  }
 0x392   : > { %v2845_v19 = vpop.eup %1936 }
 0x393   : > { %v2847_v20 = vpop.eup %1938 }
 0x394   : > { %843 = vperm.xlu1 %1919, %v2792_v51   ;;  %v2851_v16 = vpop.eup %1940 }
 0x395   : > { %1029 = vperm.xlu0 %1918, %v2817_v2  }
 0x397   : > { %v2853_v21 = vpop.eup %1942 }
 0x398   : > { %1019 = vperm.xlu1 %1919, %v2823_v0   ;;  %v2857_v22 = vpop.eup %1944 }
 0x399   : > { %1039 = vperm.xlu0 %1918, %v2825_v8   ;;  %v2860_v25 = vpop.eup %1946 }
 0x39c   : > { %1024 = vperm.xlu1 %1919, %v2831_v12  }
 0x39d   : > { %1049 = vperm.xlu0 %1918, %v2833_v13  }
 0x3a0   : > { %1034 = vperm.xlu1 %1919, %v2839_v3  }
 0x3a1   : > { %1069 = vperm.xlu0 %1918, %v2841_v7  }
 0x3a4   : > { %1044 = vperm.xlu1 %1919, %v2845_v19  }
 0x3a5   : > { %1059 = vperm.xlu0 %1918, %v2847_v20  }
 0x3a8   : > { %1064 = vperm.xlu1 %1919, %v2851_v16  }
 0x3a9   : > { %1079 = vperm.xlu0 %1918, %v2853_v21  }
 0x3ac   : > { %1054 = vperm.xlu1 %1919, %v2857_v22  }
 0x3b0   : > { %1074 = vperm.xlu1 %1919, %v2860_v25  }
 0x3ea   : > { %v784_v35 = vpop.permute.xlu1 %783 }
 0x3eb   : > { %v853_v45 = vsub.f32 %v2650_v26, %v784_v35  ;;  %v774_v47 = vpop.permute.xlu0 %773 }
 0x3ec   : > { %v851_v48 = vsub.f32 %v2653_v27, %v774_v47 }
 0x3ed   : > { %v871_v49 = vmul.f32 1.442695, %v853_v45 }
 0x3ee   : > { %v867_v52 = vmul.f32 1.442695, %v851_v48  ;;  %v789_v53 = vpop.permute.xlu1 %788 }
 0x3ef   : > { %1948 = vpow2.f32 %v871_v49  ;;  %v854_v54 = vsub.f32 %v2656_v28, %v789_v53 }
 0x3f0   : > { %1950 = vpow2.f32 %v867_v52 }
 0x3f1   : > { %v873_v57 = vmul.f32 1.442695, %v854_v54 }
 0x3f2   : > { %v779_v59 = vpop.permute.xlu1 %778 }
 0x3f3   : > { %1952 = vpow2.f32 %v873_v57  ;;  %v852_v62 = vsub.f32 %v2658_v29, %v779_v59 }
 0x3f5   : > { %v869_v63 = vmul.f32 1.442695, %v852_v62 }
 0x3f7   : > { %1954 = vpow2.f32 %v869_v63  ;;  %v804_v1 = vpop.permute.xlu1 %803 }
 0x3f8   : > { %v857_v26 = vsub.f32 %v2662_v30, %v804_v1 }
 0x3f9   : > { %v1949_v43 = vpop.eup %1948 }
 0x3fa   : > { %v1951_v56 = vpop.eup %1950  ;;  %v879_v27 = vmul.f32 1.442695, %v857_v26  ;;  %935 = vadd.xlane.f32.xlu0 %v1949_v43 }
 0x3fb   : > { %931 = vadd.xlane.f32.xlu1 %v1951_v56  ;;  %v794_v60 = vpop.permute.xlu1 %793 }
 0x3fc   : > { %1956 = vpow2.f32 %v879_v27  ;;  %v855_v28 = vsub.f32 %v2664_v31, %v794_v60 }
 0x3fd   : > { %v1953_v55 = vpop.eup %1952 }
 0x3fe   : > { %v875_v58 = vmul.f32 1.442695, %v855_v28  ;;  %v1109_v4 = vpack.c.bf16 %v1953_v55, %v1949_v43 }
 0x3ff   : > { %937 = vadd.xlane.f32.xlu1 %v1953_v55  ;;  %v799_v5 = vpop.permute.xlu1 %798 }
 0x400   : > { %1958 = vpow2.f32 %v875_v58  ;;  %v856_v29 = vsub.f32 %v2670_v33, %v799_v5  ;;  %v819_v6 = vpop.permute.xlu0 %818 }
 0x401   : > { %v1955_v61 = vpop.eup %1954  ;;  %v860_v11 = vsub.f32 %v2682_v38, %v819_v6 }
 0x402   : > { %v877_v30 = vmul.f32 1.442695, %v856_v29  ;;  %933 = vadd.xlane.f32.xlu0 %v1955_v61  ;;  %v1108_v10 = vpack.c.bf16 %v1955_v61, %v1951_v56 }
 0x403   : > { %v809_v9 = vpop.permute.xlu1 %808  ;;  %v885_v35 = vmul.f32 1.442695, %v860_v11  ;;  %v767_v11 = vmul.f32 1.442695, %v737_v50 }
 0x404   : > { %1960 = vpow2.f32 %v877_v30  ;;  %v858_v14 = vsub.f32 %v2667_v32, %v809_v9  ;;  %v829_v31 = vpop.permute.xlu0 %828  ;;  %1734 = vmatprep.mubr.bf16.mxu1 %v1108_v10  ;;  %v769_v9 = vmul.f32 1.442695, %v738_v44 }
 0x405   : > { %1735 = vmatmul.mubr.bf16.vlgmr.msra.gmra.mrb[0].mxu1 %v1109_v4  ;;  %v862_v45 = vsub.f32 %v2678_v37, %v829_v31 }
 0x406   : > { %v1957_v15 = vpop.eup %1956  ;;  %v881_v18 = vmul.f32 1.442695, %v858_v14 }
 0x407   : > { %943 = vadd.xlane.f32.xlu0 %v1957_v15  ;;  %v814_v33 = vpop.permute.xlu1 %813  ;;  %v889_v52 = vmul.f32 1.442695, %v862_v45 }
 0x408   : > { %1962 = vpow2.f32 %v881_v18  ;;  %v859_v47 = vsub.f32 %v2676_v36, %v814_v33  ;;  %v839_v48 = vpop.permute.xlu0 %838 }
 0x409   : > { %1964 = vpow2.f32 %v885_v35  ;;  %v864_v32 = vsub.f32 %v2694_v42, %v839_v48 }
 0x40a   : > { %v1959_v49 = vpop.eup %1958  ;;  %v883_v38 = vmul.f32 1.442695, %v859_v47 }
 0x40b   : > { %939 = vadd.xlane.f32.xlu0 %v1959_v49  ;;  %v824_v53 = vpop.permute.xlu1 %823  ;;  %v893_v62 = vmul.f32 1.442695, %v864_v32 }
 0x40c   : > { %1966 = vpow2.f32 %v883_v38  ;;  %v861_v54 = vsub.f32 %v2674_v34, %v824_v53  ;;  %v849_v57 = vpop.permute.xlu0 %848 }
 0x40d   : > { %1968 = vpow2.f32 %v889_v52  ;;  %v866_v63 = vsub.f32 %v2690_v41, %v849_v57  ;;  %v899_v52 = vld [vmem:[#allocation4] sm:$0xff] }
 0x40e   : > { %v1961_v59 = vpop.eup %1960  ;;  %v887_v37 = vmul.f32 1.442695, %v861_v54  ;;  %v915_v54 = vmul.f32 %v2810_v46, %v899_v52  ;;  %v905_v46 = vld [vmem:[#allocation4 + $0x30] sm:$0xff] }
 0x40f   : > { %v834_v36 = vpop.permute.xlu1 %833  ;;  %v1110_v1 = vpack.c.bf16 %v1961_v59, %v1959_v49  ;;  %v897_v56 = vmul.f32 1.442695, %v866_v63  ;;  %v901_v49 = vld [vmem:[#allocation4 + $0x10] sm:$0xff] }
 0x410   : > { %1970 = vpow2.f32 %v887_v37  ;;  %v863_v26 = vsub.f32 %v2688_v40, %v834_v36  ;;  %v917_v32 = vmul.f32 %v2831_v12, %v901_v49  ;;  %v902_v37 = vld [vmem:[#allocation4 + $0x18] sm:$0xff]  ;;  %v900_v36 = vld [vmem:[#allocation4 + $0x8] sm:$0xff] }
 0x411   : > { %1738 = vmatprep.mubr.bf16.mxu1 %v1110_v1  ;;  %1972 = vpow2.f32 %v893_v62  ;;  %v918_v63 = vmul.f32 %v2817_v2, %v902_v37 }
 0x412   : > { %v1963_v43 = vpop.eup %1962  ;;  %v891_v42 = vmul.f32 1.442695, %v863_v26 }
 0x413   : > { %945 = vadd.xlane.f32.xlu1 %v1963_v43  ;;  %v844_v27 = vpop.permute.xlu1 %843  ;;  %v1111_v34 = vpack.c.bf16 %v1963_v43, %v1957_v15  ;;  %v1965_v28 = vpop.eup %1964  ;;  %v916_v43 = vmul.f32 %v2823_v0, %v900_v36  ;;  %v906_v0 = vld [vmem:[#allocation4 + $0x38] sm:$0xff]  ;;  %v911_v36 = vld [vmem:[#allocation4 + $0x60] sm:$0xff] }
 0x414   : > { %1974 = vpow2.f32 %v891_v42  ;;  %v865_v60 = vsub.f32 %v2686_v39, %v844_v27  ;;  %v2891_v15 = vpop.permute.xlu0 %1014 }
 0x415   : > { %1739 = vmatmul.mubr.bf16.gmra.mrb[4].mxu1 %v1111_v34  ;;  %1976 = vpow2.f32 %v897_v56  ;;  %v921_v56 = vmul.f32 %v2845_v19, %v905_v46  ;;  %v903_v34 = vld [vmem:[#allocation4 + $0x20] sm:$0xff] }
 0x416   : > { %v1967_v55 = vpop.eup %1966  ;;  %v895_v41 = vmul.f32 1.442695, %v865_v60  ;;  %v919_v2 = vmul.f32 %v2839_v3, %v903_v34  ;;  %v997_v34 = vld [vmem:[#allocation5 + $0x8] sm:$0xff] }
 0x417   : > { %941 = vadd.xlane.f32.xlu1 %v1961_v59  ;;  %v1112_v58 = vpack.c.bf16 %v1965_v28, %v1967_v55  ;;  %v1969_v40 = vpop.eup %1968  ;;  %v2893_v18 = vpop.permute.xlu1 %1019 }
 0x418   : > { %1978 = vpow2.f32 %v895_v41  ;;  %v2895_v24 = vpop.permute.xlu0 %1029  ;;  %v922_v41 = vmul.f32 %v2833_v13, %v906_v0  ;;  %v907_v13 = vld [vmem:[#allocation4 + $0x40] sm:$0xff]  ;;  %v1093_v0 = vmul.f32 %v2893_v18, %v997_v34 }
 0x419   : > { %1742 = vmatprep.mubr.bf16.mxu1 %v1112_v58  ;;  %1980 = vpow2.f32 %v767_v11  ;;  %v908_v11 = vld [vmem:[#allocation4 + $0x48] sm:$0xff] }
 0x41a   : > { %v1971_v4 = vpop.eup %1970  ;;  %1982 = vpow2.f32 %v769_v9  ;;  %v924_v52 = vmul.f32 %v2847_v20, %v908_v11 }
 0x41b   : > { %953 = vadd.xlane.f32.xlu1 %v1969_v40  ;;  %951 = vadd.xlane.f32.xlu0 %v1971_v4  ;;  %v1113_v5 = vpack.c.bf16 %v1969_v40, %v1971_v4  ;;  %v1973_v29 = vpop.eup %1972  ;;  %v2897_v51 = vpop.permute.xlu1 %1024  ;;  %v904_v40 = vld [vmem:[#allocation4 + $0x28] sm:$0xff] }
 0x41c   : > { %v2899_v50 = vpop.permute.xlu0 %1039  ;;  %v920_v19 = vmul.f32 %v2825_v8, %v904_v40  ;;  %v923_v8 = vmul.f32 %v2857_v22, %v907_v13  ;;  %v912_v22 = vld [vmem:[#allocation4 + $0x68] sm:$0xff] }
 0x41d   : > { %1743 = vmatmul.mubr.bf16.gmra.mrb[8].mxu1 %v1113_v5 }
 0x41e   : > { %v1975_v6 = vpop.eup %1974 }
 0x41f   : > { %949 = vadd.xlane.f32.xlu1 %v1965_v28  ;;  %947 = vadd.xlane.f32.xlu0 %v1967_v55  ;;  %v1114_v39 = vpack.c.bf16 %v1973_v29, %v1975_v6  ;;  %v1977_v61 = vpop.eup %1976  ;;  %v2901_v17 = vpop.permute.xlu1 %1034 }
 0x420   : > { %v2903_v23 = vpop.permute.xlu0 %1049 }
 0x421   : > { %1746 = vmatprep.mubr.bf16.mxu1 %v1114_v39 }
 0x422   : > { %v1979_v30 = vpop.eup %1978 }
 0x423   : > { %961 = vadd.xlane.f32.xlu1 %v1977_v61  ;;  %959 = vadd.xlane.f32.xlu0 %v1979_v30  ;;  %v1115_v10 = vpack.c.bf16 %v1977_v61, %v1979_v30  ;;  %v2885_v14 = vpop.eup %1980  ;;  %v2905_v44 = vpop.permute.xlu1 %1044 }
 0x424   : > { %v2888_v31 = vpop.eup %1982  ;;  %v2907_v35 = vpop.permute.xlu0 %1069 }
 0x425   : > { %1747 = vmatmul.mubr.bf16.gmra.mrb[12].mxu1 %v1115_v10 }
 0x427   : > { %957 = vadd.xlane.f32.xlu1 %v1973_v29  ;;  %955 = vadd.xlane.f32.xlu0 %v1975_v6  ;;  %v2909_v45 = vpop.permute.xlu1 %1064  ;;  %v909_v29 = vld [vmem:[#allocation4 + $0x50] sm:$0xff]  ;;  %v910_v6 = vld [vmem:[#allocation4 + $0x58] sm:$0xff] }
 0x428   : > { %v2911_v33 = vpop.permute.xlu0 %1059  ;;  %v925_v3 = vmul.f32 %v2851_v16, %v909_v29  ;;  %v926_v61 = vmul.f32 %v2841_v7, %v910_v6  ;;  %v914_v16 = vld [vmem:[#allocation4 + $0x78] sm:$0xff] }
 0x429   : > { %v930_v37 = vmul.f32 %v2888_v31, %v914_v16  ;;  %v1003_v29 = vld [vmem:[#allocation5 + $0x38] sm:$0xff] }
 0x42a   : > { %v1099_v18 = vmul.f32 %v2903_v23, %v1003_v29 }
 0x42b   : > { %v2913_v47 = vpop.permute.xlu1 %1054 }
 0x42c   : > { %v2915_v48 = vpop.permute.xlu0 %1079 }
 0x42f   : > { %v2917_v38 = vpop.permute.xlu1 %1074 }
 0x438   : > { %1084 = vperm.xlu1 %1919, %v2885_v14  }
 0x43d   : > { %1089 = vperm.xlu0 %1918, %v2888_v31   ;;  %v998_v31 = vld [vmem:[#allocation5 + $0x10] sm:$0xff] }
 0x487   : > { %v936_v53 = vpop.xlane.xlu0 %935 }
 0x488   : > { %v965_v57 = vadd.f32 %v936_v53, %v917_v32  ;;  %v932_v59 = vpop.xlane.xlu1 %931 }
 0x489   : > { %v963_v62 = vadd.f32 %v932_v59, %v915_v54  ;;  %v913_v54 = vld [vmem:[#allocation4 + $0x70] sm:$0xff] }
 0x48a   : > { %982 = vst.msk [vmem:[#allocation4 + $0x10] sm:$0xff] %vm979_vm1, %v965_v57  ;;  %v929_v59 = vmul.f32 %v2885_v14, %v913_v54 }
 0x48b   : > { %980 = vst.msk [vmem:[#allocation4] sm:$0xff] %vm979_vm1, %v963_v62 }
 0x48c   : > { %v938_v1 = vpop.xlane.xlu1 %937 }
 0x48d   : > { %v966_v26 = vadd.f32 %v938_v1, %v918_v63 }
 0x48f   : > { %983 = vst.msk [vmem:[#allocation4 + $0x18] sm:$0xff] %vm979_vm1, %v966_v26  ;;  %v934_v12 = vpop.xlane.xlu0 %933  ;;  %v927_v26 = vmul.f32 %v2860_v25, %v911_v36 }
 0x490   : > { %v964_v42 = vadd.f32 %v934_v12, %v916_v43  ;;  %v928_v43 = vmul.f32 %v2853_v21, %v912_v22 }
 0x492   : > { %981 = vst.msk [vmem:[#allocation4 + $0x8] sm:$0xff] %vm979_vm1, %v964_v42 }
 0x494   : > { %v944_v27 = vpop.xlane.xlu0 %943 }
 0x495   : > { %v969_v60 = vadd.f32 %v944_v27, %v921_v56  ;;  %v996_v56 = vld [vmem:[#allocation5] sm:$0xff]  ;;  %v999_v27 = vld [vmem:[#allocation5 + $0x18] sm:$0xff] }
 0x496   : > { %v1095_v25 = vmul.f32 %v2895_v24, %v999_v27 }
 0x497   : > { %986 = vst.msk [vmem:[#allocation4 + $0x30] sm:$0xff] %vm979_vm1, %v969_v60  ;;  %v1094_v60 = vmul.f32 %v2897_v51, %v998_v31  ;;  %v1000_v51 = vld [vmem:[#allocation5 + $0x20] sm:$0xff] }
 0x498   : > { %v940_v28 = vpop.xlane.xlu0 %939  ;;  %v1096_v24 = vmul.f32 %v2901_v17, %v1000_v51  ;;  %v1005_v17 = vld [vmem:[#allocation5 + $0x48] sm:$0xff] }
 0x499   : > { %v967_v55 = vadd.f32 %v940_v28, %v919_v2  ;;  %v1092_v2 = vmul.f32 %v2891_v15, %v996_v56  ;;  %v1001_v15 = vld [vmem:[#allocation5 + $0x28] sm:$0xff] }
 0x49b   : > { %984 = vst.msk [vmem:[#allocation4 + $0x20] sm:$0xff] %vm979_vm1, %v967_v55 }
 0x4a0   : > { %v946_v58 = vpop.xlane.xlu1 %945 }
 0x4a1   : > { %v970_v4 = vadd.f32 %v946_v58, %v922_v41 }
 0x4a3   : > { %987 = vst.msk [vmem:[#allocation4 + $0x38] sm:$0xff] %vm979_vm1, %v970_v4 }
 0x4a4   : > { %v942_v5 = vpop.xlane.xlu1 %941 }
 0x4a5   : > { %v968_v39 = vadd.f32 %v942_v5, %v920_v19  ;;  %v1002_v5 = vld [vmem:[#allocation5 + $0x30] sm:$0xff] }
 0x4a6   : > { %v1098_v6 = vmul.f32 %v2905_v44, %v1002_v5  ;;  %v1007_v44 = vld [vmem:[#allocation5 + $0x58] sm:$0xff] }
 0x4a7   : > { %985 = vst.msk [vmem:[#allocation4 + $0x28] sm:$0xff] %vm979_vm1, %v968_v39 }
 0x4a8   : > { %v952_v30 = vpop.xlane.xlu0 %951  ;;  %v954_v10 = vpop.xlane.xlu1 %953 }
 0x4a9   : > { %v973_v9 = vadd.f32 %v952_v30, %v925_v3  ;;  %v974_v49 = vadd.f32 %v954_v10, %v926_v61  ;;  %v1097_v30 = vmul.f32 %v2899_v50, %v1001_v15  ;;  %v1103_v50 = vmul.f32 %v2907_v35, %v1007_v44 }
 0x4ab   : > { %990 = vst.msk [vmem:[#allocation4 + $0x50] sm:$0xff] %vm979_vm1, %v973_v9  ;;  %991 = vst.msk [vmem:[#allocation4 + $0x58] sm:$0xff] %vm979_vm1, %v974_v49  ;;  %v1006_v49 = vld [vmem:[#allocation5 + $0x50] sm:$0xff] }
 0x4ac   : > { %v948_v32 = vpop.xlane.xlu0 %947  ;;  %v950_v53 = vpop.xlane.xlu1 %949 }
 0x4ad   : > { %v971_v57 = vadd.f32 %v948_v32, %v923_v8  ;;  %v972_v7 = vadd.f32 %v950_v53, %v924_v52  ;;  %v1004_v52 = vld [vmem:[#allocation5 + $0x40] sm:$0xff]  ;;  %v1102_v32 = vmul.f32 %v2909_v45, %v1006_v49  ;;  %v1011_v45 = vld [vmem:[#allocation5 + $0x78] sm:$0xff] }
 0x4ae   : > { %v1100_v23 = vmul.f32 %v2913_v47, %v1004_v52 }
 0x4af   : > { %988 = vst.msk [vmem:[#allocation4 + $0x40] sm:$0xff] %vm979_vm1, %v971_v57  ;;  %989 = vst.msk [vmem:[#allocation4 + $0x48] sm:$0xff] %vm979_vm1, %v972_v7  ;;  %v1101_v57 = vmul.f32 %v2911_v33, %v1005_v17 }
 0x4b0   : > { %v960_v62 = vpop.xlane.xlu0 %959  ;;  %v962_v63 = vpop.xlane.xlu1 %961 }
 0x4b1   : > { %v977_v1 = vadd.f32 %v960_v62, %v929_v59  ;;  %v978_v20 = vadd.f32 %v962_v63, %v930_v37  ;;  %v1010_v63 = vld [vmem:[#allocation5 + $0x70] sm:$0xff] }
 0x4b2   : > { %v1292_v51 = vld [vmem:[#allocation4 + $0x58] sm:$0xff] (!%p1599_p7)  ;;  %v1291_v15 = vld [vmem:[#allocation4 + $0x50] sm:$0xff] (!%p1599_p7) }
 0x4b3   : > { %994 = vst.msk [vmem:[#allocation4 + $0x70] sm:$0xff] %vm979_vm1, %v977_v1  ;;  %995 = vst.msk [vmem:[#allocation4 + $0x78] sm:$0xff] %vm979_vm1, %v978_v20  ;;  %v1008_v1 = vld [vmem:[#allocation5 + $0x60] sm:$0xff]  ;;  %v1009_v20 = vld [vmem:[#allocation5 + $0x68] sm:$0xff] }
 0x4b4   : > { %v956_v12 = vpop.xlane.xlu0 %955  ;;  %v958_v42 = vpop.xlane.xlu1 %957 }
 0x4b5   : > { %v975_v46 = vadd.f32 %v956_v12, %v927_v26  ;;  %v976_v14 = vadd.f32 %v958_v42, %v928_v43  ;;  %v1104_v26 = vmul.f32 %v2917_v38, %v1008_v1  ;;  %v1281_v38 = vld [vmem:[#allocation4] sm:$0xff] (!%p1599_p7) }
 0x4b7   : > { %992 = vst.msk [vmem:[#allocation4 + $0x60] sm:$0xff] %vm979_vm1, %v975_v46  ;;  %993 = vst.msk [vmem:[#allocation4 + $0x68] sm:$0xff] %vm979_vm1, %v976_v14  ;;  %v1105_v46 = vmul.f32 %v2915_v48, %v1009_v20  ;;  %v1282_v48 = vld [vmem:[#allocation4 + $0x8] sm:$0xff] (!%p1599_p7) }
 0x4b8   : > { %v1085_v36 = vpop.permute.xlu1 %1084 }
 0x4b9   : > { %v1106_v35 = vmul.f32 %v1085_v36, %v1010_v63 }
 0x4bc   : > { %v1090_v47 = vpop.permute.xlu0 %1089 }
 0x4bd   : > { %v1107_v33 = vmul.f32 %v1090_v47, %v1011_v45 }
 0x4d8   : > { %v1736_v28 = vpop.f32.mrb[0].mxu1 }
 0x4d9   : > { %v1215_v21 = vadd.f32 %v1736_v28, %v1094_v60  ;;  %v1150_v55 = vpop.f32.mrb[1].mxu1  ;;  %v1283_v60 = vld [vmem:[#allocation4 + $0x10] sm:$0xff] (!%p1599_p7)  ;;  %v2264_v28 = vmov (!%p1599_p7), 0  }
 0x4da   : > { %v1213_v41 = vadd.f32 %v1150_v55, %v1092_v2  ;;  %v1737_v58 = vpop.f32.mrb[2].mxu1  ;;  %v1284_v2 = vld [vmem:[#allocation4 + $0x18] sm:$0xff] (!%p1599_p7)  ;;  %1985 = vset.pattern.permute.xlu1 (!%p1599_p7), %v2264_v28  ;;  %1984 = vset.pattern.permute.xlu0 (!%p1599_p7), %v2264_v28  ;;  %1986 = vrcp.f32 (!%p1599_p7), %v1283_v60 }
 0x4db   : > { %1231 = vst [vmem:[#allocation5 + $0x10] sm:$0xff] %v1215_v21  ;;  %v1216_v40 = vadd.f32 %v1737_v58, %v1095_v25  ;;  %v1153_v4 = vpop.f32.mrb[3].mxu1  ;;  %1988 = vrcp.f32 (!%p1599_p7), %v1281_v38  ;;  %v1286_v25 = vld [vmem:[#allocation4 + $0x28] sm:$0xff] (!%p1599_p7)  ;;  %v1285_v21 = vld [vmem:[#allocation4 + $0x20] sm:$0xff] (!%p1599_p7)  ;;  %v1288_v55 = vld [vmem:[#allocation4 + $0x38] sm:$0xff] (!%p1599_p7) }
 0x4dc   : > { %1229 = vst [vmem:[#allocation5] sm:$0xff] %v1213_v41  ;;  %v1214_v19 = vadd.f32 %v1153_v4, %v1093_v0  ;;  %1990 = vrcp.f32 (!%p1599_p7), %v1284_v2  ;;  %v1287_v0 = vld [vmem:[#allocation4 + $0x30] sm:$0xff] (!%p1599_p7) }
 0x4dd   : > { %1232 = vst [vmem:[#allocation5 + $0x18] sm:$0xff] %v1216_v40  ;;  %1992 = vrcp.f32 (!%p1599_p7), %v1282_v48  ;;  %v1290_v40 = vld [vmem:[#allocation4 + $0x48] sm:$0xff] (!%p1599_p7) }
 0x4de   : > { %1230 = vst [vmem:[#allocation5 + $0x8] sm:$0xff] %v1214_v19  ;;  %1994 = vrcp.f32 (!%p1599_p7), %v1286_v25  ;;  %v1289_v19 = vld [vmem:[#allocation4 + $0x40] sm:$0xff] (!%p1599_p7) }
 0x4df   : > { %1996 = vrcp.f32 (!%p1599_p7), %v1285_v21 }
 0x4e0   : > { %1998 = vrcp.f32 (!%p1599_p7), %v1288_v55 }
 0x4e1   : > { %2000 = vrcp.f32 (!%p1599_p7), %v1287_v0 }
 0x4e2   : > { %2002 = vrcp.f32 (!%p1599_p7), %v1290_v40  ;;  %v1267_v17 = vld [vmem:[#allocation5 + $0x10] sm:$0xff] (!%p1599_p7) }
 0x4e3   : > { %2004 = vrcp.f32 (!%p1599_p7), %v1289_v19 }
 0x4e4   : > { %v1987_v41 = vpop.eup (!%p1599_p7), %1986  ;;  %2006 = vrcp.f32 (!%p1599_p7), %v1292_v51 }
 0x4e5   : > { %v1989_v58 = vpop.eup (!%p1599_p7), %1988  ;;  %1325 = vperm.xlu1 (!%p1599_p7), %1985, %v1987_v41   ;;  %2008 = vrcp.f32 (!%p1599_p7), %v1291_v15 }
 0x4e6   : > { %v1991_v4 = vpop.eup (!%p1599_p7), %1990  ;;  %1315 = vperm.xlu0 (!%p1599_p7), %1984, %v1989_v58  }
 0x4e7   : > { %v1993_v5 = vpop.eup (!%p1599_p7), %1992 }
 0x4e8   : > { %v1740_v39 = vpop.f32.mrb[4].mxu1  ;;  %v1995_v29 = vpop.eup (!%p1599_p7), %1994 }
 0x4e9   : > { %v1219_v3 = vadd.f32 %v1740_v39, %v1098_v6  ;;  %v1166_v61 = vpop.f32.mrb[5].mxu1  ;;  %1330 = vperm.xlu1 (!%p1599_p7), %1985, %v1991_v4   ;;  %v1997_v6 = vpop.eup (!%p1599_p7), %1996 }
 0x4ea   : > { %v1217_v10 = vadd.f32 %v1166_v61, %v1096_v24  ;;  %v1741_v13 = vpop.f32.mrb[6].mxu1  ;;  %1320 = vperm.xlu0 (!%p1599_p7), %1984, %v1993_v5   ;;  %v1294_v24 = vld [vmem:[#allocation4 + $0x68] sm:$0xff] (!%p1599_p7)  ;;  %v1999_v39 = vpop.eup (!%p1599_p7), %1998  ;;  %v1296_v61 = vld [vmem:[#allocation4 + $0x78] sm:$0xff] (!%p1599_p7) }
 0x4eb   : > { %1235 = vst [vmem:[#allocation5 + $0x30] sm:$0xff] %v1219_v3  ;;  %v1220_v11 = vadd.f32 %v1741_v13, %v1099_v18  ;;  %v1169_v9 = vpop.f32.mrb[7].mxu1  ;;  %v1293_v18 = vld [vmem:[#allocation4 + $0x60] sm:$0xff] (!%p1599_p7)  ;;  %v2001_v3 = vpop.eup (!%p1599_p7), %2000  ;;  %2010 = vrcp.f32 (!%p1599_p7), %v1294_v24 }
 0x4ec   : > { %1233 = vst [vmem:[#allocation5 + $0x20] sm:$0xff] %v1217_v10  ;;  %v1218_v8 = vadd.f32 %v1169_v9, %v1097_v30  ;;  %2012 = vrcp.f32 (!%p1599_p7), %v1293_v18  ;;  %v2003_v30 = vpop.eup (!%p1599_p7), %2002  ;;  %v1295_v10 = vld [vmem:[#allocation4 + $0x70] sm:$0xff] (!%p1599_p7) }
 0x4ed   : > { %1236 = vst [vmem:[#allocation5 + $0x38] sm:$0xff] %v1220_v11  ;;  %1340 = vperm.xlu1 (!%p1599_p7), %1985, %v1995_v29   ;;  %v2005_v13 = vpop.eup (!%p1599_p7), %2004  ;;  %2014 = vrcp.f32 (!%p1599_p7), %v1296_v61 }
 0x4ee   : > { %1234 = vst [vmem:[#allocation5 + $0x28] sm:$0xff] %v1218_v8  ;;  %1335 = vperm.xlu0 (!%p1599_p7), %1984, %v1997_v6   ;;  %2016 = vrcp.f32 (!%p1599_p7), %v1295_v10  ;;  %v2007_v11 = vpop.eup (!%p1599_p7), %2006 }
 0x4ef   : > { %v2009_v9 = vpop.eup (!%p1599_p7), %2008 }
 0x4f0   : > { %v1744_v53 = vpop.f32.mrb[8].mxu1 }
 0x4f1   : > { %v1223_v54 = vadd.f32 %v1744_v53, %v1102_v32  ;;  %v1182_v16 = vpop.f32.mrb[9].mxu1  ;;  %1350 = vperm.xlu1 (!%p1599_p7), %1985, %v1999_v39   ;;  %v1265_v32 = vld [vmem:[#allocation5] sm:$0xff] (!%p1599_p7) }
 0x4f2   : > { %v1221_v7 = vadd.f32 %v1182_v16, %v1100_v23  ;;  %v1745_v59 = vpop.f32.mrb[10].mxu1  ;;  %1345 = vperm.xlu0 (!%p1599_p7), %1984, %v2001_v3   ;;  %v1268_v16 = vld [vmem:[#allocation5 + $0x18] sm:$0xff] (!%p1599_p7) }
 0x4f3   : > { %1239 = vst [vmem:[#allocation5 + $0x50] sm:$0xff] %v1223_v54  ;;  %v1224_v37 = vadd.f32 %v1745_v59, %v1103_v50  ;;  %v1185_v62 = vpop.f32.mrb[11].mxu1  ;;  %v1269_v36 = vld [vmem:[#allocation5 + $0x20] sm:$0xff] (!%p1599_p7) }
 0x4f4   : > { %1237 = vst [vmem:[#allocation5 + $0x40] sm:$0xff] %v1221_v7  ;;  %v1222_v22 = vadd.f32 %v1185_v62, %v1101_v57  ;;  %v1266_v57 = vld [vmem:[#allocation5 + $0x8] sm:$0xff] (!%p1599_p7)  ;;  %v1272_v20 = vld [vmem:[#allocation5 + $0x38] sm:$0xff] (!%p1599_p7) }
 0x4f5   : > { %1240 = vst [vmem:[#allocation5 + $0x58] sm:$0xff] %v1224_v37  ;;  %1360 = vperm.xlu1 (!%p1599_p7), %1985, %v2003_v30   ;;  %v2011_v49 = vpop.eup (!%p1599_p7), %2010  ;;  %v1270_v63 = vld [vmem:[#allocation5 + $0x28] sm:$0xff] (!%p1599_p7) }
 0x4f6   : > { %1238 = vst [vmem:[#allocation5 + $0x48] sm:$0xff] %v1222_v22  ;;  %1355 = vperm.xlu0 (!%p1599_p7), %1984, %v2005_v13   ;;  %v2013_v8 = vpop.eup (!%p1599_p7), %2012 }
 0x4f7   : > { %v2015_v52 = vpop.eup (!%p1599_p7), %2014 }
 0x4f8   : > { %v1748_v43 = vpop.f32.mrb[12].mxu1  ;;  %1264 = sbr.rel (%p1599_p7) target bundleno = 1413 (0x585), region = 52  ;;  %v2017_v44 = vpop.eup (!%p1599_p7), %2016 }
 0x4f9   : > { %v1227_v12 = vadd.f32 %v1748_v43, %v1106_v35  ;;  %v1198_v42 = vpop.f32.mrb[13].mxu1  ;;  %1370 = vperm.xlu1 (!%p1599_p7), %1985, %v2007_v11   ;;  %v1271_v35 = vld [vmem:[#allocation5 + $0x30] sm:$0xff] (!%p1599_p7) }
 0x4fa   : > { %v1225_v14 = vadd.f32 %v1198_v42, %v1104_v26  ;;  %v1749_v31 = vpop.f32.mrb[14].mxu1  ;;  %1365 = vperm.xlu0 (!%p1599_p7), %1984, %v2009_v9   ;;  %v1275_v60 = vld [vmem:[#allocation5 + $0x50] sm:$0xff] (!%p1599_p7) }
 0x4fb   : > { %1243 = vst [vmem:[#allocation5 + $0x70] sm:$0xff] %v1227_v12  ;;  %v1228_v56 = vadd.f32 %v1749_v31, %v1107_v33  ;;  %v1201_v27 = vpop.f32.mrb[15].mxu1 }
 0x4fc   : > { %1241 = vst [vmem:[#allocation5 + $0x60] sm:$0xff] %v1225_v14  ;;  %v1226_v34 = vadd.f32 %v1201_v27, %v1105_v46  ;;  %v1273_v46 = vld [vmem:[#allocation5 + $0x40] sm:$0xff] (!%p1599_p7) }
 0x4fd   : > { %1244 = vst [vmem:[#allocation5 + $0x78] sm:$0xff] %v1228_v56  ;;  %1380 = vperm.xlu1 (!%p1599_p7), %1985, %v2011_v49   ;;  %v1274_v42 = vld [vmem:[#allocation5 + $0x48] sm:$0xff] (!%p1599_p7) }
 0x4fe   : > { %1242 = vst [vmem:[#allocation5 + $0x68] sm:$0xff] %v1226_v34  ;;  %1375 = vperm.xlu0 (!%p1599_p7), %1984, %v2013_v8   ;;  %v1276_v34 = vld [vmem:[#allocation5 + $0x58] sm:$0xff] (!%p1599_p7) }
 0x501   : > { %1390 = vperm.xlu1 %1985, %v2015_v52  }
 0x502   : > { %1385 = vperm.xlu0 %1984, %v2017_v44   ;;  %v1279_v4 = vld [vmem:[#allocation5 + $0x70] sm:$0xff] }
 0x503   : > { %v1277_v21 = vld [vmem:[#allocation5 + $0x60] sm:$0xff] }
 0x504   : > { %v1280_v40 = vld [vmem:[#allocation5 + $0x78] sm:$0xff] }
 0x505   : > { %v1278_v25 = vld [vmem:[#allocation5 + $0x68] sm:$0xff] }
 0x564   : > { %v1326_v23 = vpop.permute.xlu1 %1325 }
 0x565   : > { %v1395_v53 = vmul.f32 %v1326_v23, %v1267_v17  ;;  %v1316_v50 = vpop.permute.xlu0 %1315 }
 0x566   : > { %v1393_v54 = vmul.f32 %v1316_v50, %v1265_v32 }
 0x567   : > { %1411 = vst [vmem:[%s2583_s27 + $0x10] sm:$0xff] %v1395_v53 }
 0x568   : > { %1409 = vst [vmem:[%s2583_s27] sm:$0xff] %v1393_v54  ;;  %v1331_v7 = vpop.permute.xlu1 %1330 }
 0x569   : > { %v1396_v59 = vmul.f32 %v1331_v7, %v1268_v16  ;;  %v1321_v37 = vpop.permute.xlu0 %1320 }
 0x56a   : > { %v1394_v62 = vmul.f32 %v1321_v37, %v1266_v57 }
 0x56b   : > { %1412 = vst [vmem:[%s2583_s27 + $0x18] sm:$0xff] %v1396_v59 }
 0x56c   : > { %1410 = vst [vmem:[%s2583_s27 + $0x8] sm:$0xff] %v1394_v62  ;;  %v1341_v22 = vpop.permute.xlu1 %1340 }
 0x56d   : > { %v1398_v1 = vmul.f32 %v1341_v22, %v1270_v63  ;;  %v1336_v45 = vpop.permute.xlu0 %1335 }
 0x56e   : > { %v1397_v47 = vmul.f32 %v1336_v45, %v1269_v36 }
 0x56f   : > { %1414 = vst [vmem:[%s2583_s27 + $0x28] sm:$0xff] %v1398_v1 }
 0x570   : > { %1413 = vst [vmem:[%s2583_s27 + $0x20] sm:$0xff] %v1397_v47  ;;  %v1351_v26 = vpop.permute.xlu1 %1350 }
 0x571   : > { %v1400_v43 = vmul.f32 %v1351_v26, %v1272_v20  ;;  %v1346_v33 = vpop.permute.xlu0 %1345 }
 0x572   : > { %v1399_v12 = vmul.f32 %v1346_v33, %v1271_v35 }
 0x573   : > { %1416 = vst [vmem:[%s2583_s27 + $0x38] sm:$0xff] %v1400_v43 }
 0x574   : > { %1415 = vst [vmem:[%s2583_s27 + $0x30] sm:$0xff] %v1399_v12  ;;  %v1361_v14 = vpop.permute.xlu1 %1360 }
 0x575   : > { %v1402_v31 = vmul.f32 %v1361_v14, %v1274_v42  ;;  %v1356_v56 = vpop.permute.xlu0 %1355 }
 0x576   : > { %v1401_v27 = vmul.f32 %v1356_v56, %v1273_v46 }
 0x577   : > { %1418 = vst [vmem:[%s2583_s27 + $0x48] sm:$0xff] %v1402_v31 }
 0x578   : > { %1417 = vst [vmem:[%s2583_s27 + $0x40] sm:$0xff] %v1401_v27  ;;  %v1371_v38 = vpop.permute.xlu1 %1370 }
 0x579   : > { %v1404_v2 = vmul.f32 %v1371_v38, %v1276_v34  ;;  %v1366_v28 = vpop.permute.xlu0 %1365 }
 0x57a   : > { %v1403_v48 = vmul.f32 %v1366_v28, %v1275_v60 }
 0x57b   : > { %1420 = vst [vmem:[%s2583_s27 + $0x58] sm:$0xff] %v1404_v2 }
 0x57c   : > { %1419 = vst [vmem:[%s2583_s27 + $0x50] sm:$0xff] %v1403_v48  ;;  %v1381_v55 = vpop.permute.xlu1 %1380 }
 0x57d   : > { %v1406_v0 = vmul.f32 %v1381_v55, %v1278_v25  ;;  %v1376_v41 = vpop.permute.xlu0 %1375 }
 0x57e   : > { %v1405_v58 = vmul.f32 %v1376_v41, %v1277_v21 }
 0x57f   : > { %1422 = vst [vmem:[%s2583_s27 + $0x68] sm:$0xff] %v1406_v0 }
 0x580   : > { %1421 = vst [vmem:[%s2583_s27 + $0x60] sm:$0xff] %v1405_v58  ;;  %v1391_v19 = vpop.permute.xlu1 %1390 }
 0x581   : > { %v1408_v5 = vmul.f32 %v1391_v19, %v1280_v40  ;;  %v1386_v51 = vpop.permute.xlu0 %1385 }
 0x582   : > { %v1407_v29 = vmul.f32 %v1386_v51, %v1279_v4 }
 0x583   : > { %1424 = vst [vmem:[%s2583_s27 + $0x78] sm:$0xff] %v1408_v5 }
 0x584   : > { %1423 = vst [vmem:[%s2583_s27 + $0x70] sm:$0xff] %v1407_v29 }
 0x585 PF: > { %s3123_s5 = sld [smem:[#allocation19_spill]]  ;;  %s3124_s6 = sld [smem:[#allocation20_spill]] }
 0x586   : > { %s1441_s11 = sshll.u32 %s2583_s27, 4  ;;  %s3126_s30 = sld [smem:[#allocation29_spill]]  ;;  %s2985_s11 = int_to_ptr.vmem [resolvable:$true] %s1441_s11 }
 0x587   : > { %s1426_s8 = scalar_lea.sflag [#allocation8], %s2561_s29  ;;  %s2106_s26 = scalar_lea.vmem %s2985_s11, 2048 }
 0x588   : > { %p2107_p11 = scmp.ne.s32.totalorder %s2985_s11, %s2106_s26  ;;  %s2265_s15 = smov [#allocation12]  }
 0x589   : > { %s2110_s27 = sshll.u32 %s2265_s15, 4  ;;  %s2111_s27 = int_to_ptr.vmem [resolvable:$false] %s2110_s27 }
 0x58a   : > { %p2108_p0 = pnand %p2107_p11, %p2426_p12  ;;  %s2112_s25 = scalar_lea.vmem %s2111_s27, 4096 }
 0x58b   : > { %s1601_s2 = sshll.u32 %s3123_s5, 4  ;;  %s1602_s20 = sshll.u32 %s3124_s6, 5 }
 0x58c   : > { %s1438_s9 = sadd.s32 %s1602_s20, %s1601_s2  ;;  %p2109_p9 = pneg %p2108_p0 }
 0x58d   : > { %s1603_s18 = sshll.u32 %s1438_s9, 7  ;;  %p2113_p6 = scmp.lt.s32.totalorder %s2985_s11, %s2111_s27 }
 0x58e   : > { %s2990_s12 = scalar_lea.hbm %s3126_s30, %s1603_s18  ;;  %p2114_p8 = scmp.lt.s32.totalorder %s2112_s25, %s2106_s26 }
 0x590   : > { %p2115_p10 = por %p2114_p8, %p2113_p6 }
 0x592   : > { %p2116_p2 = pnand %p2115_p10, %p2109_p9 }
 0x594   : > { %2119 = shalt.err (!%p2116_p2)
}
 0x595   : > { %s2120_s28 = scalar_lea.hbm %s2990_s12, 2048  ;;  %s2124_s2 = scalar_lea.hbm %s3126_s30, 8192 }
 0x596   : > { %p2121_p1 = scmp.ne.s32.totalorder %s2990_s12, %s2120_s28  ;;  %p2125_p13 = scmp.lt.u32.totalorder %s2990_s12, %s3126_s30 }
 0x597   : > { %p2126_p5 = scmp.lt.u32.totalorder %s2124_s2, %s2120_s28  ;;  %p2128_p11 = scmp.lt.u32.totalorder %s2120_s28, %s2990_s12 }
 0x598   : > { %p2122_p3 = pnand %p2121_p1, %p2426_p12 }
 0x599   : > { %p2127_p7 = por %p2126_p5, %p2125_p13 }
 0x59a   : > { %p2123_p4 = pneg %p2122_p3 }
 0x59b   : > { %p2129_p0 = por %p2128_p11, %p2127_p7 }
 0x59d   : > { %p2130_p9 = pnand %p2129_p0, %p2123_p4 }
 0x59f   : > { %2133 = shalt.err (!%p2130_p9)
}
 0x5a0   : > { %s2266_s18 = smov 128   ;;  %s2267_s3 = smov 8  }
 0x5a1   : > { %1774 = dma.vmem_to_hbm [thread:$0]  (%p2426_p12), %s2985_s11, 2048, %s2990_s12, %s1426_s8, %s2266_s18, %s2266_s18, %s2267_s3  }
 0x5a2 PF: > { %s3127_s10 = sld [smem:[#allocation17_spill]]  ;;  %s3128_s26 = sld [smem:[#allocation23_spill]] }
 0x5a3   : > { %p1794_p6 = scmp.ge.s32.totalorder %s2252_s24, 2 }
 0x5a8   : > { %s1456_s15 = sand.u32 1, %s3127_s10   ;;  %p3129_p8 = scmp.ne.s32.totalorder %s3128_s26, 0 }
 0x5a9   : > { %s1457_s27 = scalar_lea.sflag [#allocation8], %s1456_s15 }
 0x5aa   : > { %p1788_p10 = pnand %p1794_p6, %p3129_p8 }
 0x5ac   : > { %2199 = dma.done.wait (!%p1788_p10), %s1457_s27, 2048  }
 0x5ad   : > { %2201 = vsyncadd (!%p1788_p10), %s1457_s27, 4294965248  ;;  %s22_s24 = sadd.s32 1, %s2252_s24   ;;  %s3131_s29 = sld [smem:[#allocation24_spill]] }
 0x5ae   : > { %p3021_p2 = scmp.ge.s32.totalorder %s22_s24, 10   ;;  %s3132_s7 = sld [smem:[#allocation26_spill]] }
 0x5af   : > { %s3133_s11 = sld [smem:[#allocation27_spill]]  ;;  %s3134_s12 = smov %s2208_s13 }
 0x5b0   : > { %s3135_s13 = smov %s2212_s14  ;;  %s3136_s14 = smov %s2506_s4 }
 0x5b1   : > { %s3137_s15 = smov %s2220_s16  ;;  %s3138_s16 = smov %s2224_s17 }
 0x5b2   : > { %s3139_s17 = smov %s2449_s19  ;;  %s3140_s18 = smov %s2240_s21 }
 0x5b3   : > { %s3141_s19 = smov %s2244_s22  ;;  %s3142_s20 = smov %s2248_s23 }
 0x5b4   : > { %s3143_s21 = smov %s3131_s29  ;;  %s3144_s22 = smov %s3132_s7 }
 0x5b5   : > { %s3145_s23 = smov %s3133_s11  ;;  %21 = sbr.rel (!%p3021_p2) target bundleno = 15 (0xf), region = 102 }
 0x5bc   :  { %1462 = vsyncpa [#allocation7], 1 }
 0x5bd   :  { %1464 = vsyncpa [#allocation7 + $0x1], 1 }
 0x5be   :  { %1465 = vsyncpa [#allocation10], 1 }
 0x5bf   :  { %1467 = vsyncpa [#allocation10 + $0x1], 1 }
 0x5c0   :  { %1468 = vsyncpa [#allocation8], 1 }
 0x5c1   :  { %1470 = vsyncpa [#allocation8 + $0x1], 1 }

</bundles_post_ra>
